<compile_context>
chip_gen: v7x
topology: tpu7x:2x2x1
jax: 0.10.0
libtpu: 0.0.40
codegen_flags: <defaults>
</compile_context>

<pallas_src>
import functools

import jax
import jax.numpy as jnp
from jax import lax
from jax.experimental import pallas as pl
from jax.experimental.pallas import tpu as pltpu


def _round_up(v, m):
    return -(-v // m) * m


def _pad_channels(c):
    # Lane-dense (128) at production channel counts, minimal padding otherwise.
    return _round_up(c, 128) if c >= 128 else _round_up(c, 8)


def _axis_phase_params(K, s, p, op, size_in):
    """Polyphase parameters for one spatial axis of a stride-s transposed conv.

    For output parity r (o = s*q + r):
        y[s*q + r] = sum_t w_flip[s*t + c_r] * x[q + t + delta_r]
    where t runs over the VALID taps only (s*t + c_r < K) and x is zero-padded
    by (pad_lo, pad_hi).  off_r = delta_r + pad_lo is the start offset into the
    padded input.
    """
    lp = K - 1 - p                           # left pad of equivalent direct conv
    O = (size_in - 1) * s - 2 * p + K + op   # output length
    T = -(-K // s)                           # ceil(K / s): max taps per phase
    Q = -(-O // s)                           # ceil(O / s): per-phase output length
    phases = []
    for r in range(s):
        c = (lp - r) % s
        delta = (r + c - lp) // s
        taps = tuple(t for t in range(T) if s * t + c < K)   # valid tap indices
        ks = tuple(s * t + c for t in taps)                   # kernel positions
        phases.append({"c": c, "delta": delta, "taps": taps, "ks": ks})
    pad_lo = max(0, -min(ph["delta"] for ph in phases))
    offs = tuple(ph["delta"] + pad_lo for ph in phases)
    return O, Q, T, phases, offs, pad_lo


def _vmem_limit_bytes():
    """Generation-aware VMEM budget (~75% of physical, never the hardcoded 64MiB)."""
    cap = 64 * 1024 * 1024
    try:
        info = pltpu.get_tpu_info()
        cap = int(getattr(info, "vmem_capacity_bytes", cap)) or cap
    except Exception:
        pass
    return int(max(32 * 1024 * 1024, min(int(cap * 0.75), 128 * 1024 * 1024)))


def _convt3d_group_kernel(*refs, n_d_taps, Th, tws, Qh_t, Qw_p, Cin_p, hoffs, woff):
    """One grid step of one (rd, rw) phase group: (n, qd, qh-tile, rh).

    refs = (x_slice_0 .. x_slice_{n_d_taps-1}, w_ref, b_ref, o_ref, slab_ref)
      x_slice_i : (1, 1, Hp, Wp, Cin_p)  padded input depth plane qd + doff + td_i
      w_ref     : (s, K_g, Cout_p)       resident phase-group packed weights
      b_ref     : (1, Cout_p)            f32 bias
      o_ref     : (1, 1, 1, Qh_t, Qw_p, Cout_p) output tile (phase-major layout)
      slab_ref  : (Qh_t, Qw_p, K_g)      VMEM im2col scratch
    """
    x_refs = refs[:n_d_taps]
    w_ref, b_ref, o_ref, slab_ref = refs[n_d_taps:n_d_taps + 4]

    qh0 = pl.program_id(2) * Qh_t
    rh = pl.program_id(3)
    hoff = hoffs[0] + (hoffs[1] - hoffs[0]) * rh           # s == 2

    # im2col: one wide (Qh_t, Qw_p, Cin_p) store per valid tap (<= 8 stores).
    col = 0
    for ti in range(n_d_taps):
        for th in range(Th):
            row0 = hoff + th + qh0
            for tw in tws:
                slab_ref[:, :, col:col + Cin_p] = x_refs[ti][
                    0, 0, pl.ds(row0, Qh_t), pl.ds(woff + tw, Qw_p), :]
                col += Cin_p

    # One MXU contraction over all valid taps; f32 accumulate + f32 epilogue.
    # TODO(synk): add the no-slab per-tap dot_general accumulation variant for
    # Cin >= 256 (halves per-step VMEM; K=Cin already fills the MXU there).
    slab2d = slab_ref[...].reshape(Qh_t * Qw_p, col)
    acc = jnp.dot(slab2d, w_ref[rh], preferred_element_type=jnp.float32)
    acc = acc + b_ref[...]
    o_ref[0, 0, 0] = acc.reshape(Qh_t, Qw_p, acc.shape[-1]).astype(o_ref.dtype)


def conv_transpose3d_pallas(x, w, b, *, stride=2, padding=1, output_padding=1,
                            compute_dtype=None, qh_tile=None):
    """x: (N, Cin, D, H, W); w: (Cin, Cout, Kd, Kh, Kw) (PyTorch ConvTranspose3d
    weight layout); b: (Cout,).  Returns (N, Cout, OD, OH, OW)."""
    N, Cin, D, H, W = x.shape
    assert w.shape[0] == Cin
    Cout, Kd, Kh, Kw = (int(w.shape[1]), int(w.shape[2]),
                        int(w.shape[3]), int(w.shape[4]))
    s, p, op = stride, padding, output_padding
    assert s == 2, "kernel is specialized for stride=2 (the module default)"
    for K in (Kd, Kh, Kw):
        assert K - 1 - p >= 0, "requires padding <= kernel_size - 1"
        assert K >= s, "requires kernel_size >= stride"
    if compute_dtype is None:
        compute_dtype = x.dtype   # pass jnp.bfloat16 for v5e/v6e/v7x MXU throughput

    OD, Qd, Td, d_ph, d_offs, pdlo = _axis_phase_params(Kd, s, p, op, D)
    OH, Qh, Th, h_ph, h_offs, phlo = _axis_phase_params(Kh, s, p, op, H)
    OW, Qw, Tw, w_ph, w_offs, pwlo = _axis_phase_params(Kw, s, p, op, W)

    Cin_p = _pad_channels(Cin)
    Cout_p = _pad_channels(Cout)
    Qw_p = _round_up(Qw, 8)

    itemsize = jnp.dtype(compute_dtype).itemsize
    vmem_limit = _vmem_limit_bytes()
    if qh_tile is None:
        # Bound the im2col slab so slab + double-buffered input planes + resident
        # weights + output tiles fit the per-generation VMEM budget (v7x-critical).
        slab_budget = max(4 * 1024 * 1024, vmem_limit // 8)
        k_max = Td * Th * Tw * Cin_p
        qh_tile = max(1, min(Qh, slab_budget // max(1, Qw_p * k_max * itemsize)))
    qh_tile = max(1, min(int(qh_tile), Qh))
    Qh_p = _round_up(Qh, qh_tile)
    n_qh = Qh_p // qh_tile

    def _pad_hi(offs, q_pad, T, size, plo):
        return max(0, max(offs) + (q_pad - 1) + (T - 1) - (size - 1 + plo))

    pdhi = _pad_hi(d_offs, Qd, Td, D, pdlo)
    phhi = _pad_hi(h_offs, Qh_p, Th, H, phlo)
    pwhi = _pad_hi(w_offs, Qw_p, Tw, W, pwlo)

    # Channels-last + halo/alignment pad (polyphase: NO stride-inserted zeros).
    # TODO(synk): consumers that accept NDHWC could take the kernel output
    # directly (drops one full HBM round trip on each side of the kernel).
    x_l = jnp.transpose(x, (0, 2, 3, 4, 1)).astype(compute_dtype)
    x_pad = jnp.pad(x_l, ((0, 0), (pdlo, pdhi), (phlo, phhi), (pwlo, pwhi),
                          (0, Cin_p - Cin)))
    Dp, Hp, Wp = x_pad.shape[1:4]

    # Spatially flipped kernel -> (Kd, Kh, Kw, Cin, Cout).
    w_f = jnp.transpose(jnp.flip(w, (2, 3, 4)), (2, 3, 4, 0, 1))
    b_pad = jnp.pad(b.astype(jnp.float32).reshape(1, Cout),
                    ((0, 0), (0, Cout_p - Cout)))

    compiler_params = pltpu.CompilerParams(
        dimension_semantics=("parallel", "parallel", "arbitrary", "arbitrary"),
        vmem_limit_bytes=vmem_limit)

    parts = {}
    for rd in range(s):
        tds, kds = d_ph[rd]["taps"], d_ph[rd]["ks"]
        doff = d_offs[rd]
        for rw in range(s):
            tws, kws = w_ph[rw]["taps"], w_ph[rw]["ks"]
            woff = w_offs[rw]
            n_d, n_w = len(tds), len(tws)
            K_g = n_d * Th * n_w * Cin_p

            # Phase-group packed weights: only valid depth/width taps; invalid
            # height taps (none for Kh=4) stay zero.
            wp = jnp.zeros((s, n_d, Th, n_w, Cin_p, Cout_p), w_f.dtype)
            for rh in range(s):
                ch = h_ph[rh]["c"]
                for ti, kd in enumerate(kds):
                    for th in range(Th):
                        kh = s * th + ch
                        if kh >= Kh:
                            continue
                        for twi, kw in enumerate(kws):
                            wp = wp.at[rh, ti, th, twi, :Cin, :Cout].set(
                                w_f[kd, kh, kw])
            wp = wp.reshape(s, K_g, Cout_p).astype(compute_dtype)

            kernel = functools.partial(
                _convt3d_group_kernel, n_d_taps=n_d, Th=Th, tws=tws,
                Qh_t=qh_tile, Qw_p=Qw_p, Cin_p=Cin_p, hoffs=tuple(h_offs),
                woff=woff)

            # Depth-slice inputs: index depends only on (n, qd) -> Pallas reuses
            # the fetched plane across the two inner ("arbitrary") grid axes.
            x_specs = [
                pl.BlockSpec((1, 1, Hp, Wp, Cin_p),
                             lambda n, qd, qt, rh, _o=doff + td:
                                 (n, qd + _o, 0, 0, 0))
                for td in tds]

            out_g = pl.pallas_call(
                kernel,
                out_shape=jax.ShapeDtypeStruct(
                    (N, s, Qd, Qh_p, Qw_p, Cout_p), x.dtype),
                grid=(N, Qd, n_qh, s),
                in_specs=x_specs + [
                    # Fully VMEM-resident weights & bias (constant index_map).
                    pl.BlockSpec((s, K_g, Cout_p),
                                 lambda n, qd, qt, rh: (0, 0, 0)),
                    pl.BlockSpec((1, Cout_p), lambda n, qd, qt, rh: (0, 0)),
                ],
                out_specs=pl.BlockSpec(
                    (1, 1, 1, qh_tile, Qw_p, Cout_p),
                    lambda n, qd, qt, rh: (n, rh, qd, qt, 0, 0)),
                scratch_shapes=[pltpu.VMEM((qh_tile, Qw_p, K_g), compute_dtype)],
                compiler_params=compiler_params,
            )(*([x_pad] * n_d), wp, b_pad)
            parts[(rd, rw)] = out_g

    # Interleave the s^3 parity phases and fold the channels-last -> NCDHW
    # conversion into one transpose; crop the ceil/alignment padding.
    stacked = jnp.stack(
        [jnp.stack([parts[(rd, rw)] for rw in range(s)], axis=0)
         for rd in range(s)], axis=0)      # (rd, rw, N, rh, Qd, Qh_p, Qw_p, Cout_p)
    out = jnp.transpose(stacked, (2, 7, 4, 0, 5, 3, 6, 1))
    out = out.reshape(N, Cout_p, s * Qd, s * Qh_p, s * Qw_p)
    return out[:, :Cout, :OD, :OH, :OW]


def conv_transpose3d_reference(x, w, b, *, stride=2, padding=1, output_padding=1):
    """Pure-XLA reference (lax.conv_general_dilated form of ConvTranspose3d)."""
    Kd, Kh, Kw = w.shape[2:]
    s, p, op = stride, padding, output_padding
    w_rhs = jnp.transpose(jnp.flip(w, (2, 3, 4)), (1, 0, 2, 3, 4))  # (Cout,Cin,K..)
    out = lax.conv_general_dilated(
        x, w_rhs,
        window_strides=(1, 1, 1),
        padding=[(K - 1 - p, K - 1 - p + op) for K in (Kd, Kh, Kw)],
        lhs_dilation=(s, s, s),
        rhs_dilation=(1, 1, 1),
        dimension_numbers=("NCDHW", "OIDHW", "NCDHW"))
    return out + b[None, :, None, None, None]


if __name__ == "__main__":
    # Small shapes consistent with the module defaults (k_size=(3,4,3), s=2).
    N, Cin, Cout = 2, 4, 8
    D = H = W = 6
    k_size = (3, 4, 3)
    stride, padding, output_padding = 2, 1, 1

    key = jax.random.PRNGKey(0)
    kx, kw, kb = jax.random.split(key, 3)
    x = jax.random.normal(kx, (N, Cin, D, H, W), dtype=jnp.float32)
    weight = jax.random.uniform(kw, (Cin, Cout) + k_size, dtype=jnp.float32,
                                minval=-0.1, maxval=0.1)
    bias = jax.random.uniform(kb, (Cout,), dtype=jnp.float32,
                              minval=-0.1, maxval=0.1)

    ref = jax.block_until_ready(conv_transpose3d_reference(
        x, weight, bias, stride=stride, padding=padding,
        output_padding=output_padding))
    exp = tuple((i - 1) * stride - 2 * padding + k + output_padding
                for i, k in zip((D, H, W), k_size))

    # f32 path (jit so the pre/post layout plumbing fuses inside XLA).
    run_f32 = jax.jit(functools.partial(
        conv_transpose3d_pallas, stride=stride, padding=padding,
        output_padding=output_padding))
    out = jax.block_until_ready(run_f32(x, weight, bias))
    assert out.shape == (N, Cout) + exp, out.shape
    assert jnp.allclose(out, ref, atol=1e-4, rtol=1e-4), \
        f"f32 max abs err {jnp.max(jnp.abs(out - ref))}"

    # bf16 compute path (v6e/v7x MXU) + explicit H tiling, loosened tolerance.
    run_bf16 = jax.jit(functools.partial(
        conv_transpose3d_pallas, stride=stride, padding=padding,
        output_padding=output_padding, compute_dtype=jnp.bfloat16, qh_tile=4))
    out_bf16 = jax.block_until_ready(run_bf16(x, weight, bias))
    assert out_bf16.shape == (N, Cout) + exp, out_bf16.shape
    assert jnp.allclose(out_bf16, ref, atol=5e-2, rtol=5e-2), \
        f"bf16 max abs err {jnp.max(jnp.abs(out_bf16 - ref))}"

    print("KERNEL_OK")
</pallas_src>

<mosaic_0001>
module attributes {stable_mosaic.version = 11 : i64} {
  func.func @_convt3d_group_kernel(%arg0: i32, %arg1: i32, %arg2: i32, %arg3: i32, %arg4: memref<1x1x9x9x8xf32, #tpu.memory_space<vmem>>, %arg5: memref<1x1x9x9x8xf32, #tpu.memory_space<vmem>>, %arg6: memref<2x32x8xf32, #tpu.memory_space<vmem>>, %arg7: memref<1x8xf32, #tpu.memory_space<vmem>>, %arg8: memref<1x1x1x7x8x8xf32, #tpu.memory_space<vmem>>, %arg9: memref<7x8x32xf32, #tpu.memory_space<vmem>>) attributes {dimension_semantics = [#tpu.dimension_semantics<parallel>, #tpu.dimension_semantics<parallel>, #tpu.dimension_semantics<arbitrary>, #tpu.dimension_semantics<arbitrary>], iteration_bounds = array<i64: 2, 6, 1, 2>, scalar_prefetch = 0 : i64, scratch_operands = 1 : i64, tpu.core_type = #tpu.core_type<tc>, window_params = [{transform_indices = @transform_0, window_bounds = array<i64: 1, 1, 9, 9, 8>}, {transform_indices = @transform_1, window_bounds = array<i64: 1, 1, 9, 9, 8>}, {pipeline_mode = #tpu.pipeline_mode<synchronous>, transform_indices = @transform_2, window_bounds = array<i64: 2, 32, 8>}, {pipeline_mode = #tpu.pipeline_mode<synchronous>, transform_indices = @transform_3, window_bounds = array<i64: 1, 8>}, {transform_indices = @transform_4, window_bounds = array<i64: 1, 1, 1, 7, 8, 8>}]} {
    %c7_i32 = arith.constant 7 : i32
    %0 = arith.muli %arg2, %c7_i32 : i32
    %c1_i32 = arith.constant 1 : i32
    %1 = arith.muli %c1_i32, %arg3 : i32
    %c0_i32 = arith.constant 0 : i32
    %2 = arith.addi %c0_i32, %1 : i32
    %c0_i32_0 = arith.constant 0 : i32
    %3 = arith.addi %2, %c0_i32_0 : i32
    %4 = arith.addi %3, %0 : i32
    %c0 = arith.constant 0 : index
    %c0_1 = arith.constant 0 : index
    %5 = arith.index_cast %4 : i32 to index
    %c0_2 = arith.constant 0 : index
    %c0_3 = arith.constant 0 : index
    %6 = vector.load %arg4[%c0, %c0_1, %5, %c0_2, %c0_3] : memref<1x1x9x9x8xf32, #tpu.memory_space<vmem>>, vector<1x1x7x8x8xf32>
    %7 = vector.shape_cast %6 : vector<1x1x7x8x8xf32> to vector<7x8x8xf32>
    %c0_4 = arith.constant 0 : index
    %c0_5 = arith.constant 0 : index
    %c0_6 = arith.constant 0 : index
    %8 = vector.load %arg9[%c0_4, %c0_5, %c0_6] : memref<7x8x32xf32, #tpu.memory_space<vmem>>, vector<7x8x8xf32>
    tpu.vector_store %arg9[%c0_4, %c0_5, %c0_6], %7 {strides = array<i32>} : memref<7x8x32xf32, #tpu.memory_space<vmem>>, vector<7x8x8xf32>,
    %c1_i32_7 = arith.constant 1 : i32
    %9 = arith.addi %2, %c1_i32_7 : i32
    %10 = arith.addi %9, %0 : i32
    %c0_8 = arith.constant 0 : index
    %c0_9 = arith.constant 0 : index
    %11 = arith.index_cast %10 : i32 to index
    %c0_10 = arith.constant 0 : index
    %c0_11 = arith.constant 0 : index
    %12 = vector.load %arg4[%c0_8, %c0_9, %11, %c0_10, %c0_11] : memref<1x1x9x9x8xf32, #tpu.memory_space<vmem>>, vector<1x1x7x8x8xf32>
    %13 = vector.shape_cast %12 : vector<1x1x7x8x8xf32> to vector<7x8x8xf32>
    %c0_12 = arith.constant 0 : index
    %c0_13 = arith.constant 0 : index
    %c8 = arith.constant 8 : index
    %14 = vector.load %arg9[%c0_12, %c0_13, %c8] : memref<7x8x32xf32, #tpu.memory_space<vmem>>, vector<7x8x8xf32>
    tpu.vector_store %arg9[%c0_12, %c0_13, %c8], %13 {strides = array<i32>} : memref<7x8x32xf32, #tpu.memory_space<vmem>>, vector<7x8x8xf32>,
    %c0_i32_14 = arith.constant 0 : i32
    %15 = arith.addi %2, %c0_i32_14 : i32
    %16 = arith.addi %15, %0 : i32
    %c0_15 = arith.constant 0 : index
    %c0_16 = arith.constant 0 : index
    %17 = arith.index_cast %16 : i32 to index
    %c0_17 = arith.constant 0 : index
    %c0_18 = arith.constant 0 : index
    %18 = vector.load %arg5[%c0_15, %c0_16, %17, %c0_17, %c0_18] : memref<1x1x9x9x8xf32, #tpu.memory_space<vmem>>, vector<1x1x7x8x8xf32>
    %19 = vector.shape_cast %18 : vector<1x1x7x8x8xf32> to vector<7x8x8xf32>
    %c0_19 = arith.constant 0 : index
    %c0_20 = arith.constant 0 : index
    %c16 = arith.constant 16 : index
    %20 = vector.load %arg9[%c0_19, %c0_20, %c16] : memref<7x8x32xf32, #tpu.memory_space<vmem>>, vector<7x8x8xf32>
    tpu.vector_store %arg9[%c0_19, %c0_20, %c16], %19 {strides = array<i32>} : memref<7x8x32xf32, #tpu.memory_space<vmem>>, vector<7x8x8xf32>,
    %c1_i32_21 = arith.constant 1 : i32
    %21 = arith.addi %2, %c1_i32_21 : i32
    %22 = arith.addi %21, %0 : i32
    %c0_22 = arith.constant 0 : index
    %c0_23 = arith.constant 0 : index
    %23 = arith.index_cast %22 : i32 to index
    %c0_24 = arith.constant 0 : index
    %c0_25 = arith.constant 0 : index
    %24 = vector.load %arg5[%c0_22, %c0_23, %23, %c0_24, %c0_25] : memref<1x1x9x9x8xf32, #tpu.memory_space<vmem>>, vector<1x1x7x8x8xf32>
    %25 = vector.shape_cast %24 : vector<1x1x7x8x8xf32> to vector<7x8x8xf32>
    %c0_26 = arith.constant 0 : index
    %c0_27 = arith.constant 0 : index
    %c24 = arith.constant 24 : index
    %26 = vector.load %arg9[%c0_26, %c0_27, %c24] : memref<7x8x32xf32, #tpu.memory_space<vmem>>, vector<7x8x8xf32>
    tpu.vector_store %arg9[%c0_26, %c0_27, %c24], %25 {strides = array<i32>} : memref<7x8x32xf32, #tpu.memory_space<vmem>>, vector<7x8x8xf32>,
    %c0_28 = arith.constant 0 : index
    %c0_29 = arith.constant 0 : index
    %c0_30 = arith.constant 0 : index
    %27 = vector.load %arg9[%c0_28, %c0_29, %c0_30] : memref<7x8x32xf32, #tpu.memory_space<vmem>>, vector<7x8x32xf32>
    %28 = vector.shape_cast %27 : vector<7x8x32xf32> to vector<56x32xf32>
    %29 = arith.index_cast %arg3 : i32 to index
    %c0_31 = arith.constant 0 : index
    %c0_32 = arith.constant 0 : index
    %30 = vector.load %arg6[%29, %c0_31, %c0_32] : memref<2x32x8xf32, #tpu.memory_space<vmem>>, vector<1x32x8xf32>
    %31 = vector.shape_cast %30 : vector<1x32x8xf32> to vector<32x8xf32>
    %cst = arith.constant dense<0.000000e+00> : vector<56x8xf32>
    %32 = tpu.matmul %28, %31, %cst {dimension_numbers = #tpu.dot_dimension_numbers<[1], [0], [0], [1], [0, 0, 1, 1], [], []>} : vector<56x32xf32>, vector<32x8xf32>, vector<56x8xf32> -> vector<56x8xf32>
    %c0_33 = arith.constant 0 : index
    %c0_34 = arith.constant 0 : index
    %33 = vector.load %arg7[%c0_33, %c0_34] : memref<1x8xf32, #tpu.memory_space<vmem>>, vector<1x8xf32>
    %34 = vector.broadcast %33 : vector<1x8xf32> to vector<56x8xf32>
    %35 = arith.addf %32, %34 : vector<56x8xf32>
    %36 = vector.shape_cast %35 : vector<56x8xf32> to vector<7x8x8xf32>
    %c0_35 = arith.constant 0 : index
    %c0_36 = arith.constant 0 : index
    %c0_37 = arith.constant 0 : index
    %c0_38 = arith.constant 0 : index
    %c0_39 = arith.constant 0 : index
    %c0_40 = arith.constant 0 : index
    %37 = vector.load %arg8[%c0_35, %c0_36, %c0_37, %c0_38, %c0_39, %c0_40] : memref<1x1x1x7x8x8xf32, #tpu.memory_space<vmem>>, vector<1x1x1x7x8x8xf32>
    %38 = vector.shape_cast %37 : vector<1x1x1x7x8x8xf32> to vector<7x8x8xf32>
    %39 = vector.shape_cast %36 : vector<7x8x8xf32> to vector<1x1x1x7x8x8xf32>
    tpu.vector_store %arg8[%c0_35, %c0_36, %c0_37, %c0_38, %c0_39, %c0_40], %39 {strides = array<i32>} : memref<1x1x1x7x8x8xf32, #tpu.memory_space<vmem>>, vector<1x1x1x7x8x8xf32>,
    return
  }
  func.func @transform_0(%arg0: i32, %arg1: i32, %arg2: i32, %arg3: i32) -> (i32, i32, i32, i32, i32) {
    %c0_i32 = arith.constant 0 : i32
    %0 = arith.addi %arg1, %c0_i32 : i32
    %c0_i32_0 = arith.constant 0 : i32
    %c0_i32_1 = arith.constant 0 : i32
    %c0_i32_2 = arith.constant 0 : i32
    %c0_i32_3 = arith.constant 0 : i32
    return %arg0, %0, %c0_i32_0, %c0_i32_1, %c0_i32_2 : i32, i32, i32, i32, i32
  }
  func.func @transform_1(%arg0: i32, %arg1: i32, %arg2: i32, %arg3: i32) -> (i32, i32, i32, i32, i32) {
    %c1_i32 = arith.constant 1 : i32
    %0 = arith.addi %arg1, %c1_i32 : i32
    %c0_i32 = arith.constant 0 : i32
    %c0_i32_0 = arith.constant 0 : i32
    %c0_i32_1 = arith.constant 0 : i32
    %c0_i32_2 = arith.constant 0 : i32
    return %arg0, %0, %c0_i32, %c0_i32_0, %c0_i32_1 : i32, i32, i32, i32, i32
  }
  func.func @transform_2(%arg0: i32, %arg1: i32, %arg2: i32, %arg3: i32) -> (i32, i32, i32) {
    %c0_i32 = arith.constant 0 : i32
    %c0_i32_0 = arith.constant 0 : i32
    %c0_i32_1 = arith.constant 0 : i32
    %c0_i32_2 = arith.constant 0 : i32
    return %c0_i32, %c0_i32_0, %c0_i32_1 : i32, i32, i32
  }
  func.func @transform_3(%arg0: i32, %arg1: i32, %arg2: i32, %arg3: i32) -> (i32, i32) {
    %c0_i32 = arith.constant 0 : i32
    %c0_i32_0 = arith.constant 0 : i32
    %c0_i32_1 = arith.constant 0 : i32
    return %c0_i32, %c0_i32_0 : i32, i32
  }
  func.func @transform_4(%arg0: i32, %arg1: i32, %arg2: i32, %arg3: i32) -> (i32, i32, i32, i32, i32, i32) {
    %c0_i32 = arith.constant 0 : i32
    %c0_i32_0 = arith.constant 0 : i32
    %c0_i32_1 = arith.constant 0 : i32
    return %arg0, %arg3, %arg1, %arg2, %c0_i32, %c0_i32_0 : i32, i32, i32, i32, i32, i32
  }
}

module attributes {stable_mosaic.version = 11 : i64} {
  func.func @_convt3d_group_kernel(%arg0: i32, %arg1: i32, %arg2: i32, %arg3: i32, %arg4: memref<1x1x9x9x8xf32, #tpu.memory_space<vmem>>, %arg5: memref<2x32x8xf32, #tpu.memory_space<vmem>>, %arg6: memref<1x8xf32, #tpu.memory_space<vmem>>, %arg7: memref<1x1x1x7x8x8xf32, #tpu.memory_space<vmem>>, %arg8: memref<7x8x32xf32, #tpu.memory_space<vmem>>) attributes {dimension_semantics = [#tpu.dimension_semantics<parallel>, #tpu.dimension_semantics<parallel>, #tpu.dimension_semantics<arbitrary>, #tpu.dimension_semantics<arbitrary>], iteration_bounds = array<i64: 2, 6, 1, 2>, scalar_prefetch = 0 : i64, scratch_operands = 1 : i64, tpu.core_type = #tpu.core_type<tc>, window_params = [{transform_indices = @transform_0, window_bounds = array<i64: 1, 1, 9, 9, 8>}, {pipeline_mode = #tpu.pipeline_mode<synchronous>, transform_indices = @transform_1, window_bounds = array<i64: 2, 32, 8>}, {pipeline_mode = #tpu.pipeline_mode<synchronous>, transform_indices = @transform_2, window_bounds = array<i64: 1, 8>}, {transform_indices = @transform_3, window_bounds = array<i64: 1, 1, 1, 7, 8, 8>}]} {
    %c7_i32 = arith.constant 7 : i32
    %0 = arith.muli %arg2, %c7_i32 : i32
    %c1_i32 = arith.constant 1 : i32
    %1 = arith.muli %c1_i32, %arg3 : i32
    %c0_i32 = arith.constant 0 : i32
    %2 = arith.addi %c0_i32, %1 : i32
    %c0_i32_0 = arith.constant 0 : i32
    %3 = arith.addi %2, %c0_i32_0 : i32
    %4 = arith.addi %3, %0 : i32
    %c0 = arith.constant 0 : index
    %c0_1 = arith.constant 0 : index
    %5 = arith.index_cast %4 : i32 to index
    %c0_2 = arith.constant 0 : index
    %c0_3 = arith.constant 0 : index
    %6 = vector.load %arg4[%c0, %c0_1, %5, %c0_2, %c0_3] : memref<1x1x9x9x8xf32, #tpu.memory_space<vmem>>, vector<1x1x7x8x8xf32>
    %7 = vector.shape_cast %6 : vector<1x1x7x8x8xf32> to vector<7x8x8xf32>
    %c0_4 = arith.constant 0 : index
    %c0_5 = arith.constant 0 : index
    %c0_6 = arith.constant 0 : index
    %8 = vector.load %arg8[%c0_4, %c0_5, %c0_6] : memref<7x8x32xf32, #tpu.memory_space<vmem>>, vector<7x8x8xf32>
    tpu.vector_store %arg8[%c0_4, %c0_5, %c0_6], %7 {strides = array<i32>} : memref<7x8x32xf32, #tpu.memory_space<vmem>>, vector<7x8x8xf32>,
    %c0_7 = arith.constant 0 : index
    %c0_8 = arith.constant 0 : index
    %9 = arith.index_cast %4 : i32 to index
    %c1 = arith.constant 1 : index
    %c0_9 = arith.constant 0 : index
    %10 = vector.load %arg4[%c0_7, %c0_8, %9, %c1, %c0_9] : memref<1x1x9x9x8xf32, #tpu.memory_space<vmem>>, vector<1x1x7x8x8xf32>
    %11 = vector.shape_cast %10 : vector<1x1x7x8x8xf32> to vector<7x8x8xf32>
    %c0_10 = arith.constant 0 : index
    %c0_11 = arith.constant 0 : index
    %c8 = arith.constant 8 : index
    %12 = vector.load %arg8[%c0_10, %c0_11, %c8] : memref<7x8x32xf32, #tpu.memory_space<vmem>>, vector<7x8x8xf32>
    tpu.vector_store %arg8[%c0_10, %c0_11, %c8], %11 {strides = array<i32>} : memref<7x8x32xf32, #tpu.memory_space<vmem>>, vector<7x8x8xf32>,
    %c1_i32_12 = arith.constant 1 : i32
    %13 = arith.addi %2, %c1_i32_12 : i32
    %14 = arith.addi %13, %0 : i32
    %c0_13 = arith.constant 0 : index
    %c0_14 = arith.constant 0 : index
    %15 = arith.index_cast %14 : i32 to index
    %c0_15 = arith.constant 0 : index
    %c0_16 = arith.constant 0 : index
    %16 = vector.load %arg4[%c0_13, %c0_14, %15, %c0_15, %c0_16] : memref<1x1x9x9x8xf32, #tpu.memory_space<vmem>>, vector<1x1x7x8x8xf32>
    %17 = vector.shape_cast %16 : vector<1x1x7x8x8xf32> to vector<7x8x8xf32>
    %c0_17 = arith.constant 0 : index
    %c0_18 = arith.constant 0 : index
    %c16 = arith.constant 16 : index
    %18 = vector.load %arg8[%c0_17, %c0_18, %c16] : memref<7x8x32xf32, #tpu.memory_space<vmem>>, vector<7x8x8xf32>
    tpu.vector_store %arg8[%c0_17, %c0_18, %c16], %17 {strides = array<i32>} : memref<7x8x32xf32, #tpu.memory_space<vmem>>, vector<7x8x8xf32>,
    %c0_19 = arith.constant 0 : index
    %c0_20 = arith.constant 0 : index
    %19 = arith.index_cast %14 : i32 to index
    %c1_21 = arith.constant 1 : index
    %c0_22 = arith.constant 0 : index
    %20 = vector.load %arg4[%c0_19, %c0_20, %19, %c1_21, %c0_22] : memref<1x1x9x9x8xf32, #tpu.memory_space<vmem>>, vector<1x1x7x8x8xf32>
    %21 = vector.shape_cast %20 : vector<1x1x7x8x8xf32> to vector<7x8x8xf32>
    %c0_23 = arith.constant 0 : index
    %c0_24 = arith.constant 0 : index
    %c24 = arith.constant 24 : index
    %22 = vector.load %arg8[%c0_23, %c0_24, %c24] : memref<7x8x32xf32, #tpu.memory_space<vmem>>, vector<7x8x8xf32>
    tpu.vector_store %arg8[%c0_23, %c0_24, %c24], %21 {strides = array<i32>} : memref<7x8x32xf32, #tpu.memory_space<vmem>>, vector<7x8x8xf32>,
    %c0_25 = arith.constant 0 : index
    %c0_26 = arith.constant 0 : index
    %c0_27 = arith.constant 0 : index
    %23 = vector.load %arg8[%c0_25, %c0_26, %c0_27] : memref<7x8x32xf32, #tpu.memory_space<vmem>>, vector<7x8x32xf32>
    %24 = vector.shape_cast %23 : vector<7x8x32xf32> to vector<56x32xf32>
    %25 = arith.index_cast %arg3 : i32 to index
    %c0_28 = arith.constant 0 : index
    %c0_29 = arith.constant 0 : index
    %26 = vector.load %arg5[%25, %c0_28, %c0_29] : memref<2x32x8xf32, #tpu.memory_space<vmem>>, vector<1x32x8xf32>
    %27 = vector.shape_cast %26 : vector<1x32x8xf32> to vector<32x8xf32>
    %cst = arith.constant dense<0.000000e+00> : vector<56x8xf32>
    %28 = tpu.matmul %24, %27, %cst {dimension_numbers = #tpu.dot_dimension_numbers<[1], [0], [0], [1], [0, 0, 1, 1], [], []>} : vector<56x32xf32>, vector<32x8xf32>, vector<56x8xf32> -> vector<56x8xf32>
    %c0_30 = arith.constant 0 : index
    %c0_31 = arith.constant 0 : index
    %29 = vector.load %arg6[%c0_30, %c0_31] : memref<1x8xf32, #tpu.memory_space<vmem>>, vector<1x8xf32>
    %30 = vector.broadcast %29 : vector<1x8xf32> to vector<56x8xf32>
    %31 = arith.addf %28, %30 : vector<56x8xf32>
    %32 = vector.shape_cast %31 : vector<56x8xf32> to vector<7x8x8xf32>
    %c0_32 = arith.constant 0 : index
    %c0_33 = arith.constant 0 : index
    %c0_34 = arith.constant 0 : index
    %c0_35 = arith.constant 0 : index
    %c0_36 = arith.constant 0 : index
    %c0_37 = arith.constant 0 : index
    %33 = vector.load %arg7[%c0_32, %c0_33, %c0_34, %c0_35, %c0_36, %c0_37] : memref<1x1x1x7x8x8xf32, #tpu.memory_space<vmem>>, vector<1x1x1x7x8x8xf32>
    %34 = vector.shape_cast %33 : vector<1x1x1x7x8x8xf32> to vector<7x8x8xf32>
    %35 = vector.shape_cast %32 : vector<7x8x8xf32> to vector<1x1x1x7x8x8xf32>
    tpu.vector_store %arg7[%c0_32, %c0_33, %c0_34, %c0_35, %c0_36, %c0_37], %35 {strides = array<i32>} : memref<1x1x1x7x8x8xf32, #tpu.memory_space<vmem>>, vector<1x1x1x7x8x8xf32>,
    return
  }
  func.func @transform_0(%arg0: i32, %arg1: i32, %arg2: i32, %arg3: i32) -> (i32, i32, i32, i32, i32) {
    %c0_i32 = arith.constant 0 : i32
    %0 = arith.addi %arg1, %c0_i32 : i32
    %c0_i32_0 = arith.constant 0 : i32
    %c0_i32_1 = arith.constant 0 : i32
    %c0_i32_2 = arith.constant 0 : i32
    %c0_i32_3 = arith.constant 0 : i32
    return %arg0, %0, %c0_i32_0, %c0_i32_1, %c0_i32_2 : i32, i32, i32, i32, i32
  }
  func.func @transform_1(%arg0: i32, %arg1: i32, %arg2: i32, %arg3: i32) -> (i32, i32, i32) {
    %c0_i32 = arith.constant 0 : i32
    %c0_i32_0 = arith.constant 0 : i32
    %c0_i32_1 = arith.constant 0 : i32
    %c0_i32_2 = arith.constant 0 : i32
    return %c0_i32, %c0_i32_0, %c0_i32_1 : i32, i32, i32
  }
  func.func @transform_2(%arg0: i32, %arg1: i32, %arg2: i32, %arg3: i32) -> (i32, i32) {
    %c0_i32 = arith.constant 0 : i32
    %c0_i32_0 = arith.constant 0 : i32
    %c0_i32_1 = arith.constant 0 : i32
    return %c0_i32, %c0_i32_0 : i32, i32
  }
  func.func @transform_3(%arg0: i32, %arg1: i32, %arg2: i32, %arg3: i32) -> (i32, i32, i32, i32, i32, i32) {
    %c0_i32 = arith.constant 0 : i32
    %c0_i32_0 = arith.constant 0 : i32
    %c0_i32_1 = arith.constant 0 : i32
    return %arg0, %arg3, %arg1, %arg2, %c0_i32, %c0_i32_0 : i32, i32, i32, i32, i32, i32
  }
}

module attributes {stable_mosaic.version = 11 : i64} {
  func.func @_convt3d_group_kernel(%arg0: i32, %arg1: i32, %arg2: i32, %arg3: i32, %arg4: memref<1x1x9x9x8xf32, #tpu.memory_space<vmem>>, %arg5: memref<1x1x9x9x8xf32, #tpu.memory_space<vmem>>, %arg6: memref<2x64x8xf32, #tpu.memory_space<vmem>>, %arg7: memref<1x8xf32, #tpu.memory_space<vmem>>, %arg8: memref<1x1x1x7x8x8xf32, #tpu.memory_space<vmem>>, %arg9: memref<7x8x64xf32, #tpu.memory_space<vmem>>) attributes {dimension_semantics = [#tpu.dimension_semantics<parallel>, #tpu.dimension_semantics<parallel>, #tpu.dimension_semantics<arbitrary>, #tpu.dimension_semantics<arbitrary>], iteration_bounds = array<i64: 2, 6, 1, 2>, scalar_prefetch = 0 : i64, scratch_operands = 1 : i64, tpu.core_type = #tpu.core_type<tc>, window_params = [{transform_indices = @transform_0, window_bounds = array<i64: 1, 1, 9, 9, 8>}, {transform_indices = @transform_1, window_bounds = array<i64: 1, 1, 9, 9, 8>}, {pipeline_mode = #tpu.pipeline_mode<synchronous>, transform_indices = @transform_2, window_bounds = array<i64: 2, 64, 8>}, {pipeline_mode = #tpu.pipeline_mode<synchronous>, transform_indices = @transform_3, window_bounds = array<i64: 1, 8>}, {transform_indices = @transform_4, window_bounds = array<i64: 1, 1, 1, 7, 8, 8>}]} {
    %c7_i32 = arith.constant 7 : i32
    %0 = arith.muli %arg2, %c7_i32 : i32
    %c1_i32 = arith.constant 1 : i32
    %1 = arith.muli %c1_i32, %arg3 : i32
    %c0_i32 = arith.constant 0 : i32
    %2 = arith.addi %c0_i32, %1 : i32
    %c0_i32_0 = arith.constant 0 : i32
    %3 = arith.addi %2, %c0_i32_0 : i32
    %4 = arith.addi %3, %0 : i32
    %c0 = arith.constant 0 : index
    %c0_1 = arith.constant 0 : index
    %5 = arith.index_cast %4 : i32 to index
    %c0_2 = arith.constant 0 : index
    %c0_3 = arith.constant 0 : index
    %6 = vector.load %arg4[%c0, %c0_1, %5, %c0_2, %c0_3] : memref<1x1x9x9x8xf32, #tpu.memory_space<vmem>>, vector<1x1x7x8x8xf32>
    %7 = vector.shape_cast %6 : vector<1x1x7x8x8xf32> to vector<7x8x8xf32>
    %c0_4 = arith.constant 0 : index
    %c0_5 = arith.constant 0 : index
    %c0_6 = arith.constant 0 : index
    %8 = vector.load %arg9[%c0_4, %c0_5, %c0_6] : memref<7x8x64xf32, #tpu.memory_space<vmem>>, vector<7x8x8xf32>
    tpu.vector_store %arg9[%c0_4, %c0_5, %c0_6], %7 {strides = array<i32>} : memref<7x8x64xf32, #tpu.memory_space<vmem>>, vector<7x8x8xf32>,
    %c0_7 = arith.constant 0 : index
    %c0_8 = arith.constant 0 : index
    %9 = arith.index_cast %4 : i32 to index
    %c1 = arith.constant 1 : index
    %c0_9 = arith.constant 0 : index
    %10 = vector.load %arg4[%c0_7, %c0_8, %9, %c1, %c0_9] : memref<1x1x9x9x8xf32, #tpu.memory_space<vmem>>, vector<1x1x7x8x8xf32>
    %11 = vector.shape_cast %10 : vector<1x1x7x8x8xf32> to vector<7x8x8xf32>
    %c0_10 = arith.constant 0 : index
    %c0_11 = arith.constant 0 : index
    %c8 = arith.constant 8 : index
    %12 = vector.load %arg9[%c0_10, %c0_11, %c8] : memref<7x8x64xf32, #tpu.memory_space<vmem>>, vector<7x8x8xf32>
    tpu.vector_store %arg9[%c0_10, %c0_11, %c8], %11 {strides = array<i32>} : memref<7x8x64xf32, #tpu.memory_space<vmem>>, vector<7x8x8xf32>,
    %c1_i32_12 = arith.constant 1 : i32
    %13 = arith.addi %2, %c1_i32_12 : i32
    %14 = arith.addi %13, %0 : i32
    %c0_13 = arith.constant 0 : index
    %c0_14 = arith.constant 0 : index
    %15 = arith.index_cast %14 : i32 to index
    %c0_15 = arith.constant 0 : index
    %c0_16 = arith.constant 0 : index
    %16 = vector.load %arg4[%c0_13, %c0_14, %15, %c0_15, %c0_16] : memref<1x1x9x9x8xf32, #tpu.memory_space<vmem>>, vector<1x1x7x8x8xf32>
    %17 = vector.shape_cast %16 : vector<1x1x7x8x8xf32> to vector<7x8x8xf32>
    %c0_17 = arith.constant 0 : index
    %c0_18 = arith.constant 0 : index
    %c16 = arith.constant 16 : index
    %18 = vector.load %arg9[%c0_17, %c0_18, %c16] : memref<7x8x64xf32, #tpu.memory_space<vmem>>, vector<7x8x8xf32>
    tpu.vector_store %arg9[%c0_17, %c0_18, %c16], %17 {strides = array<i32>} : memref<7x8x64xf32, #tpu.memory_space<vmem>>, vector<7x8x8xf32>,
    %c0_19 = arith.constant 0 : index
    %c0_20 = arith.constant 0 : index
    %19 = arith.index_cast %14 : i32 to index
    %c1_21 = arith.constant 1 : index
    %c0_22 = arith.constant 0 : index
    %20 = vector.load %arg4[%c0_19, %c0_20, %19, %c1_21, %c0_22] : memref<1x1x9x9x8xf32, #tpu.memory_space<vmem>>, vector<1x1x7x8x8xf32>
    %21 = vector.shape_cast %20 : vector<1x1x7x8x8xf32> to vector<7x8x8xf32>
    %c0_23 = arith.constant 0 : index
    %c0_24 = arith.constant 0 : index
    %c24 = arith.constant 24 : index
    %22 = vector.load %arg9[%c0_23, %c0_24, %c24] : memref<7x8x64xf32, #tpu.memory_space<vmem>>, vector<7x8x8xf32>
    tpu.vector_store %arg9[%c0_23, %c0_24, %c24], %21 {strides = array<i32>} : memref<7x8x64xf32, #tpu.memory_space<vmem>>, vector<7x8x8xf32>,
    %c0_i32_25 = arith.constant 0 : i32
    %23 = arith.addi %2, %c0_i32_25 : i32
    %24 = arith.addi %23, %0 : i32
    %c0_26 = arith.constant 0 : index
    %c0_27 = arith.constant 0 : index
    %25 = arith.index_cast %24 : i32 to index
    %c0_28 = arith.constant 0 : index
    %c0_29 = arith.constant 0 : index
    %26 = vector.load %arg5[%c0_26, %c0_27, %25, %c0_28, %c0_29] : memref<1x1x9x9x8xf32, #tpu.memory_space<vmem>>, vector<1x1x7x8x8xf32>
    %27 = vector.shape_cast %26 : vector<1x1x7x8x8xf32> to vector<7x8x8xf32>
    %c0_30 = arith.constant 0 : index
    %c0_31 = arith.constant 0 : index
    %c32 = arith.constant 32 : index
    %28 = vector.load %arg9[%c0_30, %c0_31, %c32] : memref<7x8x64xf32, #tpu.memory_space<vmem>>, vector<7x8x8xf32>
    tpu.vector_store %arg9[%c0_30, %c0_31, %c32], %27 {strides = array<i32>} : memref<7x8x64xf32, #tpu.memory_space<vmem>>, vector<7x8x8xf32>,
    %c0_32 = arith.constant 0 : index
    %c0_33 = arith.constant 0 : index
    %29 = arith.index_cast %24 : i32 to index
    %c1_34 = arith.constant 1 : index
    %c0_35 = arith.constant 0 : index
    %30 = vector.load %arg5[%c0_32, %c0_33, %29, %c1_34, %c0_35] : memref<1x1x9x9x8xf32, #tpu.memory_space<vmem>>, vector<1x1x7x8x8xf32>
    %31 = vector.shape_cast %30 : vector<1x1x7x8x8xf32> to vector<7x8x8xf32>
    %c0_36 = arith.constant 0 : index
    %c0_37 = arith.constant 0 : index
    %c40 = arith.constant 40 : index
    %32 = vector.load %arg9[%c0_36, %c0_37, %c40] : memref<7x8x64xf32, #tpu.memory_space<vmem>>, vector<7x8x8xf32>
    tpu.vector_store %arg9[%c0_36, %c0_37, %c40], %31 {strides = array<i32>} : memref<7x8x64xf32, #tpu.memory_space<vmem>>, vector<7x8x8xf32>,
    %c1_i32_38 = arith.constant 1 : i32
    %33 = arith.addi %2, %c1_i32_38 : i32
    %34 = arith.addi %33, %0 : i32
    %c0_39 = arith.constant 0 : index
    %c0_40 = arith.constant 0 : index
    %35 = arith.index_cast %34 : i32 to index
    %c0_41 = arith.constant 0 : index
    %c0_42 = arith.constant 0 : index
    %36 = vector.load %arg5[%c0_39, %c0_40, %35, %c0_41, %c0_42] : memref<1x1x9x9x8xf32, #tpu.memory_space<vmem>>, vector<1x1x7x8x8xf32>
    %37 = vector.shape_cast %36 : vector<1x1x7x8x8xf32> to vector<7x8x8xf32>
    %c0_43 = arith.constant 0 : index
    %c0_44 = arith.constant 0 : index
    %c48 = arith.constant 48 : index
    %38 = vector.load %arg9[%c0_43, %c0_44, %c48] : memref<7x8x64xf32, #tpu.memory_space<vmem>>, vector<7x8x8xf32>
    tpu.vector_store %arg9[%c0_43, %c0_44, %c48], %37 {strides = array<i32>} : memref<7x8x64xf32, #tpu.memory_space<vmem>>, vector<7x8x8xf32>,
    %c0_45 = arith.constant 0 : index
    %c0_46 = arith.constant 0 : index
    %39 = arith.index_cast %34 : i32 to index
    %c1_47 = arith.constant 1 : index
    %c0_48 = arith.constant 0 : index
    %40 = vector.load %arg5[%c0_45, %c0_46, %39, %c1_47, %c0_48] : memref<1x1x9x9x8xf32, #tpu.memory_space<vmem>>, vector<1x1x7x8x8xf32>
    %41 = vector.shape_cast %40 : vector<1x1x7x8x8xf32> to vector<7x8x8xf32>
    %c0_49 = arith.constant 0 : index
    %c0_50 = arith.constant 0 : index
    %c56 = arith.constant 56 : index
    %42 = vector.load %arg9[%c0_49, %c0_50, %c56] : memref<7x8x64xf32, #tpu.memory_space<vmem>>, vector<7x8x8xf32>
    tpu.vector_store %arg9[%c0_49, %c0_50, %c56], %41 {strides = array<i32>} : memref<7x8x64xf32, #tpu.memory_space<vmem>>, vector<7x8x8xf32>,
    %c0_51 = arith.constant 0 : index
    %c0_52 = arith.constant 0 : index
    %c0_53 = arith.constant 0 : index
    %43 = vector.load %arg9[%c0_51, %c0_52, %c0_53] : memref<7x8x64xf32, #tpu.memory_space<vmem>>, vector<7x8x64xf32>
    %44 = vector.shape_cast %43 : vector<7x8x64xf32> to vector<56x64xf32>
    %45 = arith.index_cast %arg3 : i32 to index
    %c0_54 = arith.constant 0 : index
    %c0_55 = arith.constant 0 : index
    %46 = vector.load %arg6[%45, %c0_54, %c0_55] : memref<2x64x8xf32, #tpu.memory_space<vmem>>, vector<1x64x8xf32>
    %47 = vector.shape_cast %46 : vector<1x64x8xf32> to vector<64x8xf32>
    %cst = arith.constant dense<0.000000e+00> : vector<56x8xf32>
    %48 = tpu.matmul %44, %47, %cst {dimension_numbers = #tpu.dot_dimension_numbers<[1], [0], [0], [1], [0, 0, 1, 1], [], []>} : vector<56x64xf32>, vector<64x8xf32>, vector<56x8xf32> -> vector<56x8xf32>
    %c0_56 = arith.constant 0 : index
    %c0_57 = arith.constant 0 : index
    %49 = vector.load %arg7[%c0_56, %c0_57] : memref<1x8xf32, #tpu.memory_space<vmem>>, vector<1x8xf32>
    %50 = vector.broadcast %49 : vector<1x8xf32> to vector<56x8xf32>
    %51 = arith.addf %48, %50 : vector<56x8xf32>
    %52 = vector.shape_cast %51 : vector<56x8xf32> to vector<7x8x8xf32>
    %c0_58 = arith.constant 0 : index
    %c0_59 = arith.constant 0 : index
    %c0_60 = arith.constant 0 : index
    %c0_61 = arith.constant 0 : index
    %c0_62 = arith.constant 0 : index
    %c0_63 = arith.constant 0 : index
    %53 = vector.load %arg8[%c0_58, %c0_59, %c0_60, %c0_61, %c0_62, %c0_63] : memref<1x1x1x7x8x8xf32, #tpu.memory_space<vmem>>, vector<1x1x1x7x8x8xf32>
    %54 = vector.shape_cast %53 : vector<1x1x1x7x8x8xf32> to vector<7x8x8xf32>
    %55 = vector.shape_cast %52 : vector<7x8x8xf32> to vector<1x1x1x7x8x8xf32>
    tpu.vector_store %arg8[%c0_58, %c0_59, %c0_60, %c0_61, %c0_62, %c0_63], %55 {strides = array<i32>} : memref<1x1x1x7x8x8xf32, #tpu.memory_space<vmem>>, vector<1x1x1x7x8x8xf32>,
    return
  }
  func.func @transform_0(%arg0: i32, %arg1: i32, %arg2: i32, %arg3: i32) -> (i32, i32, i32, i32, i32) {
    %c0_i32 = arith.constant 0 : i32
    %0 = arith.addi %arg1, %c0_i32 : i32
    %c0_i32_0 = arith.constant 0 : i32
    %c0_i32_1 = arith.constant 0 : i32
    %c0_i32_2 = arith.constant 0 : i32
    %c0_i32_3 = arith.constant 0 : i32
    return %arg0, %0, %c0_i32_0, %c0_i32_1, %c0_i32_2 : i32, i32, i32, i32, i32
  }
  func.func @transform_1(%arg0: i32, %arg1: i32, %arg2: i32, %arg3: i32) -> (i32, i32, i32, i32, i32) {
    %c1_i32 = arith.constant 1 : i32
    %0 = arith.addi %arg1, %c1_i32 : i32
    %c0_i32 = arith.constant 0 : i32
    %c0_i32_0 = arith.constant 0 : i32
    %c0_i32_1 = arith.constant 0 : i32
    %c0_i32_2 = arith.constant 0 : i32
    return %arg0, %0, %c0_i32, %c0_i32_0, %c0_i32_1 : i32, i32, i32, i32, i32
  }
  func.func @transform_2(%arg0: i32, %arg1: i32, %arg2: i32, %arg3: i32) -> (i32, i32, i32) {
    %c0_i32 = arith.constant 0 : i32
    %c0_i32_0 = arith.constant 0 : i32
    %c0_i32_1 = arith.constant 0 : i32
    %c0_i32_2 = arith.constant 0 : i32
    return %c0_i32, %c0_i32_0, %c0_i32_1 : i32, i32, i32
  }
  func.func @transform_3(%arg0: i32, %arg1: i32, %arg2: i32, %arg3: i32) -> (i32, i32) {
    %c0_i32 = arith.constant 0 : i32
    %c0_i32_0 = arith.constant 0 : i32
    %c0_i32_1 = arith.constant 0 : i32
    return %c0_i32, %c0_i32_0 : i32, i32
  }
  func.func @transform_4(%arg0: i32, %arg1: i32, %arg2: i32, %arg3: i32) -> (i32, i32, i32, i32, i32, i32) {
    %c0_i32 = arith.constant 0 : i32
    %c0_i32_0 = arith.constant 0 : i32
    %c0_i32_1 = arith.constant 0 : i32
    return %arg0, %arg3, %arg1, %arg2, %c0_i32, %c0_i32_0 : i32, i32, i32, i32, i32, i32
  }
}

module attributes {stable_mosaic.version = 11 : i64} {
  func.func @_convt3d_group_kernel(%arg0: i32, %arg1: i32, %arg2: i32, %arg3: i32, %arg4: memref<1x1x9x9x8xf32, #tpu.memory_space<vmem>>, %arg5: memref<2x16x8xf32, #tpu.memory_space<vmem>>, %arg6: memref<1x8xf32, #tpu.memory_space<vmem>>, %arg7: memref<1x1x1x7x8x8xf32, #tpu.memory_space<vmem>>, %arg8: memref<7x8x16xf32, #tpu.memory_space<vmem>>) attributes {dimension_semantics = [#tpu.dimension_semantics<parallel>, #tpu.dimension_semantics<parallel>, #tpu.dimension_semantics<arbitrary>, #tpu.dimension_semantics<arbitrary>], iteration_bounds = array<i64: 2, 6, 1, 2>, scalar_prefetch = 0 : i64, scratch_operands = 1 : i64, tpu.core_type = #tpu.core_type<tc>, window_params = [{transform_indices = @transform_0, window_bounds = array<i64: 1, 1, 9, 9, 8>}, {pipeline_mode = #tpu.pipeline_mode<synchronous>, transform_indices = @transform_1, window_bounds = array<i64: 2, 16, 8>}, {pipeline_mode = #tpu.pipeline_mode<synchronous>, transform_indices = @transform_2, window_bounds = array<i64: 1, 8>}, {transform_indices = @transform_3, window_bounds = array<i64: 1, 1, 1, 7, 8, 8>}]} {
    %c7_i32 = arith.constant 7 : i32
    %0 = arith.muli %arg2, %c7_i32 : i32
    %c1_i32 = arith.constant 1 : i32
    %1 = arith.muli %c1_i32, %arg3 : i32
    %c0_i32 = arith.constant 0 : i32
    %2 = arith.addi %c0_i32, %1 : i32
    %c0_i32_0 = arith.constant 0 : i32
    %3 = arith.addi %2, %c0_i32_0 : i32
    %4 = arith.addi %3, %0 : i32
    %c0 = arith.constant 0 : index
    %c0_1 = arith.constant 0 : index
    %5 = arith.index_cast %4 : i32 to index
    %c0_2 = arith.constant 0 : index
    %c0_3 = arith.constant 0 : index
    %6 = vector.load %arg4[%c0, %c0_1, %5, %c0_2, %c0_3] : memref<1x1x9x9x8xf32, #tpu.memory_space<vmem>>, vector<1x1x7x8x8xf32>
    %7 = vector.shape_cast %6 : vector<1x1x7x8x8xf32> to vector<7x8x8xf32>
    %c0_4 = arith.constant 0 : index
    %c0_5 = arith.constant 0 : index
    %c0_6 = arith.constant 0 : index
    %8 = vector.load %arg8[%c0_4, %c0_5, %c0_6] : memref<7x8x16xf32, #tpu.memory_space<vmem>>, vector<7x8x8xf32>
    tpu.vector_store %arg8[%c0_4, %c0_5, %c0_6], %7 {strides = array<i32>} : memref<7x8x16xf32, #tpu.memory_space<vmem>>, vector<7x8x8xf32>,
    %c1_i32_7 = arith.constant 1 : i32
    %9 = arith.addi %2, %c1_i32_7 : i32
    %10 = arith.addi %9, %0 : i32
    %c0_8 = arith.constant 0 : index
    %c0_9 = arith.constant 0 : index
    %11 = arith.index_cast %10 : i32 to index
    %c0_10 = arith.constant 0 : index
    %c0_11 = arith.constant 0 : index
    %12 = vector.load %arg4[%c0_8, %c0_9, %11, %c0_10, %c0_11] : memref<1x1x9x9x8xf32, #tpu.memory_space<vmem>>, vector<1x1x7x8x8xf32>
    %13 = vector.shape_cast %12 : vector<1x1x7x8x8xf32> to vector<7x8x8xf32>
    %c0_12 = arith.constant 0 : index
    %c0_13 = arith.constant 0 : index
    %c8 = arith.constant 8 : index
    %14 = vector.load %arg8[%c0_12, %c0_13, %c8] : memref<7x8x16xf32, #tpu.memory_space<vmem>>, vector<7x8x8xf32>
    tpu.vector_store %arg8[%c0_12, %c0_13, %c8], %13 {strides = array<i32>} : memref<7x8x16xf32, #tpu.memory_space<vmem>>, vector<7x8x8xf32>,
    %c0_14 = arith.constant 0 : index
    %c0_15 = arith.constant 0 : index
    %c0_16 = arith.constant 0 : index
    %15 = vector.load %arg8[%c0_14, %c0_15, %c0_16] : memref<7x8x16xf32, #tpu.memory_space<vmem>>, vector<7x8x16xf32>
    %16 = vector.shape_cast %15 : vector<7x8x16xf32> to vector<56x16xf32>
    %17 = arith.index_cast %arg3 : i32 to index
    %c0_17 = arith.constant 0 : index
    %c0_18 = arith.constant 0 : index
    %18 = vector.load %arg5[%17, %c0_17, %c0_18] : memref<2x16x8xf32, #tpu.memory_space<vmem>>, vector<1x16x8xf32>
    %19 = vector.shape_cast %18 : vector<1x16x8xf32> to vector<16x8xf32>
    %cst = arith.constant dense<0.000000e+00> : vector<56x8xf32>
    %20 = tpu.matmul %16, %19, %cst {dimension_numbers = #tpu.dot_dimension_numbers<[1], [0], [0], [1], [0, 0, 1, 1], [], []>} : vector<56x16xf32>, vector<16x8xf32>, vector<56x8xf32> -> vector<56x8xf32>
    %c0_19 = arith.constant 0 : index
    %c0_20 = arith.constant 0 : index
    %21 = vector.load %arg6[%c0_19, %c0_20] : memref<1x8xf32, #tpu.memory_space<vmem>>, vector<1x8xf32>
    %22 = vector.broadcast %21 : vector<1x8xf32> to vector<56x8xf32>
    %23 = arith.addf %20, %22 : vector<56x8xf32>
    %24 = vector.shape_cast %23 : vector<56x8xf32> to vector<7x8x8xf32>
    %c0_21 = arith.constant 0 : index
    %c0_22 = arith.constant 0 : index
    %c0_23 = arith.constant 0 : index
    %c0_24 = arith.constant 0 : index
    %c0_25 = arith.constant 0 : index
    %c0_26 = arith.constant 0 : index
    %25 = vector.load %arg7[%c0_21, %c0_22, %c0_23, %c0_24, %c0_25, %c0_26] : memref<1x1x1x7x8x8xf32, #tpu.memory_space<vmem>>, vector<1x1x1x7x8x8xf32>
    %26 = vector.shape_cast %25 : vector<1x1x1x7x8x8xf32> to vector<7x8x8xf32>
    %27 = vector.shape_cast %24 : vector<7x8x8xf32> to vector<1x1x1x7x8x8xf32>
    tpu.vector_store %arg7[%c0_21, %c0_22, %c0_23, %c0_24, %c0_25, %c0_26], %27 {strides = array<i32>} : memref<1x1x1x7x8x8xf32, #tpu.memory_space<vmem>>, vector<1x1x1x7x8x8xf32>,
    return
  }
  func.func @transform_0(%arg0: i32, %arg1: i32, %arg2: i32, %arg3: i32) -> (i32, i32, i32, i32, i32) {
    %c0_i32 = arith.constant 0 : i32
    %0 = arith.addi %arg1, %c0_i32 : i32
    %c0_i32_0 = arith.constant 0 : i32
    %c0_i32_1 = arith.constant 0 : i32
    %c0_i32_2 = arith.constant 0 : i32
    %c0_i32_3 = arith.constant 0 : i32
    return %arg0, %0, %c0_i32_0, %c0_i32_1, %c0_i32_2 : i32, i32, i32, i32, i32
  }
  func.func @transform_1(%arg0: i32, %arg1: i32, %arg2: i32, %arg3: i32) -> (i32, i32, i32) {
    %c0_i32 = arith.constant 0 : i32
    %c0_i32_0 = arith.constant 0 : i32
    %c0_i32_1 = arith.constant 0 : i32
    %c0_i32_2 = arith.constant 0 : i32
    return %c0_i32, %c0_i32_0, %c0_i32_1 : i32, i32, i32
  }
  func.func @transform_2(%arg0: i32, %arg1: i32, %arg2: i32, %arg3: i32) -> (i32, i32) {
    %c0_i32 = arith.constant 0 : i32
    %c0_i32_0 = arith.constant 0 : i32
    %c0_i32_1 = arith.constant 0 : i32
    return %c0_i32, %c0_i32_0 : i32, i32
  }
  func.func @transform_3(%arg0: i32, %arg1: i32, %arg2: i32, %arg3: i32) -> (i32, i32, i32, i32, i32, i32) {
    %c0_i32 = arith.constant 0 : i32
    %c0_i32_0 = arith.constant 0 : i32
    %c0_i32_1 = arith.constant 0 : i32
    return %arg0, %arg3, %arg1, %arg2, %c0_i32, %c0_i32_0 : i32, i32, i32, i32, i32, i32
  }
}

</mosaic_0001>

<bundles_post_ra>
// kernel: conv_transpose3d_pallas.6
= control target key start
LH: loop header
LB: loop body
LE: loop exit
PB: predicated region body
PF: predicated region fallthrough
CT: control target
= control target key end

     0   :  { %s1029_s15 = smov 0   ;;  %s1031_s16 = smov 0   ;;  %s1217_s0 = inlined_call_operand.vmem [shape: f32[2,7,9,9,8], index: 0, kind: input, shape index: {}, may-alias: {0,1}]   ;;  %s1218_s1 = inlined_call_operand.vmem [shape: f32[2,7,9,9,8], index: 1, kind: input, shape index: {}, may-alias: {0,1}]   ;;  %s1219_s2 = inlined_call_operand.vmem [shape: f32[2,32,8], index: 2, kind: input, shape index: {}]   ;;  %s1220_s3 = inlined_call_operand.vmem [shape: f32[1,8], index: 3, kind: input, shape index: {}]   ;;  %s1221_s4 = inlined_call_operand.vmem [shape: f32[2,2,6,7,8,8], index: 4, kind: output, shape index: {}]  }
   0x1   :  { %s1033_s17 = smov 0   ;;  %s1035_s18 = smov 0  }
   0x2   :  { %s1037_s19 = smov 0   ;;  %s1039_s20 = smov 0  }
   0x3   :  { %s1041_s21 = smov 0  }
   0x4 LB: > { %s29_s22 = sadd.s32 1, %s984_s18  ;;  %s36_s23 = sadd.s32 1, %s988_s19  ;;  %s996_s21 = sphi %s1041_s21, %s14_s21   ;;  %s992_s20 = sphi %s1039_s20, %s1228_s20   ;;  %s988_s19 = sphi %s1037_s19, %s1227_s19   ;;  %s984_s18 = sphi %s1035_s18, %s1226_s18   ;;  %s980_s17 = sphi %s1033_s17, %s1225_s17   ;;  %s976_s16 = sphi %s1031_s16, %s1224_s16   ;;  %s972_s15 = sphi %s1029_s15, %s1223_s15  }
   0x5   : > { %p30_p0 = scmp.ge.s32.totalorder %s29_s22, 2  ;;  %p792_p1 = scmp.ge.s32.totalorder %s996_s21, 1 }
   0x6   : > { %p220_p2 = scmp.lt.s32.totalorder %s996_s21, 25  ;;  %s40_s24 = sadd.s32 1, %s992_s20 }
   0x7   : > { %s1230_s22 = smov (%p30_p0, %s29_s22), 0  ;;  %s1232_s23 = smov (!%p30_p0, %s36_s23), %s988_s19 }
   0x8   : > { %p221_p3 = pnand %p792_p1, %p220_p2  ;;  %p38_p4 = scmp.ge.s32.totalorder %s1232_s23, 6 }
   0x9   : > { %p272_p6 = scmp.lt.s32.totalorder (!%p221_p3), %s980_s17, 1  ;;  %p274_p7 = scmp.lt.s32.totalorder (!%p221_p3), %s976_s16, 6  ;;  %v998_v0 = vmov (!%p221_p3), 0.0|0.0   ;;  %vm321_vm0 = vcmask (!%p221_p3), 64512   ;;  %vm1000_vm1 = vmmov (!%p221_p3), 0   ;;  %v1001_v14 = vmov (!%p221_p3), 0.0  }
   0xa   : > { %s1234_s23 = smov (%p38_p4, %s1232_s23), 0  ;;  %s1236_s24 = smov (!%p38_p4, %s40_s24), %s992_s20 }
   0xb   : > { %p42_p5 = scmp.ge.s32.totalorder %s1236_s24, 2  ;;  %224 = sbr.rel (%p221_p3) target bundleno = 406 (0x196), region = 36  ;;  %864 = vmatprep.subr.bf16.mxu0 (!%p221_p3), %v998_v0  ;;  %870 = vmatprep.subr.bf16.mxu1 (!%p221_p3), %v998_v0  ;;  %vm368_vm2 = vcmask (!%p221_p3), 130112   ;;  %vm412_vm3 = vcmask (!%p221_p3), 195712   ;;  %vm456_vm4 = vcmask (!%p221_p3), 261312   ;;  %vm484_vm5 = vcmask (!%p221_p3), 261120  }
   0xc   : > { %s281_s27 = sadd.s32 (!%p221_p3), 1, %s976_s16  ;;  %s796_s29 = sshll.u32 (!%p221_p3), %s972_s15, 4  ;;  %843 = vmatprep.mubr.msk.f32.mxu0 (!%p221_p3), %vm1000_vm1, %v1001_v14  ;;  %855 = vmatprep.mubr.msk.f32.mxu1 (!%p221_p3), %vm1000_vm1, %v1001_v14  ;;  %v814_v52 = vld [vmem:[%s1220_s3] ss:$0 sm:$0xff] (!%p221_p3) }
   0xd   : > { %s1238_s24 = smov (%p42_p5, %s1236_s24), 0  ;;  %p1082_p8 = scmp.lt.s32.totalorder (!%p221_p3), %s281_s27, 6 }
   0xe   : > { %s813_s6 = sshll.u32 (!%p221_p3), %s972_s15, 5  ;;  %s1003_s9 = smov (!%p221_p3), 16  }
   0xf   : > { %s1092_s10 = scalar_lea.vmem (!%p221_p3), %s1219_s2, %s813_s6  ;;  %p295_p9 = scmp.lt.s32.totalorder (!%p221_p3), %s972_s15, 1 }
  0x10   : > { %v473_v1 = vld [vmem:[%s1092_s10] sm:$0xff] (!%p221_p3)  ;;  %v474_v2 = vld [vmem:[%s1092_s10 + $0x8] sm:$0xff] (!%p221_p3)  ;;  %v475_v11 = vld [vmem:[%s1092_s10 + $0x10] sm:$0xff] (!%p221_p3)  ;;  %p297_p10 = scmp.lt.s32.totalorder (!%p221_p3), %s976_s16, 5 }
  0x11   : > { %v865_v3 = vpack.c.bf16 (!%p221_p3), %v474_v2, %v473_v1  ;;  %v476_v12 = vld [vmem:[%s1092_s10 + $0x18] sm:$0xff] (!%p221_p3) }
  0x12   : > { %s1240_s17 = smov (!%p272_p6, %s980_s17), 1  ;;  %s1242_s27 = smov (!%p1082_p8, %s281_s27), 6  ;;  %v868_v13 = vpack.c.bf16 %v476_v12, %v475_v11 }
  0x13   : > { %s275_s25 = scalar_select %p274_p7, %s976_s16, 6  ;;  %866 = vmatpush3.bf16.msra.mxu0 %v865_v3  ;;  %872 = vmatpush3.bf16.msra.mxu1 %v865_v3 }
  0x14   : > { %s875_s26 = smul.u32 126, %s1240_s17  ;;  %867 = vmatprep.subr.bf16.mxu0 %v998_v0  ;;  %871 = vmatprep.subr.bf16.mxu1 %v998_v0  ;;  %s1244_s15 = smov (!%p295_p9, %s972_s15), 1 }
  0x15   : > { %s874_s28 = smul.u32 18, %s275_s25  ;;  %s999_s25 = smov 8  }
  0x16   : > { %s1246_s16 = smov (!%p297_p10, %s976_s16), 5  ;;  %s879_s11 = smul.u32 84, %s1240_s17 }
  0x17   : > { %s278_s5 = sadd.s32 %s875_s26, %s874_s28  ;;  %s876_s28 = smul.u32 18, %s1242_s27  ;;  %869 = vmatpush3.bf16.msra.mxu0 %v868_v13  ;;  %873 = vmatpush3.bf16.msra.mxu1 %v868_v13 }
  0x18   : > { %s793_s7 = sshll.u32 %s278_s5, 3  ;;  %s877_s10 = smul.u32 7, %s1246_s16 }
  0x19   : > { %s280_s13 = scalar_lea.vmem %s1217_s0, %s793_s7  ;;  %s288_s30 = sadd.s32 %s876_s28, %s875_s26 }
  0x1a   : > { %s1101_s14 = scalar_lea.vmem %s280_s13, %s796_s29  ;;  %s794_s27 = sshll.u32 %s288_s30, 3 }
  0x1b   : > { %v798_v4 = vld [vmem:[%s1101_s14 + $0x10] sm:$0xff]  ;;  %v799_v5 = vld [vmem:[%s1101_s14 + $0x20] sm:$0xff]  ;;  %s290_s7 = scalar_lea.vmem %s1218_s1, %s794_s27  ;;  %s1002_s26 = smov 24  }
  0x1c   : > { %v802_v6 = vld [vmem:[%s1101_s14 + $0x50] sm:$0xff]  ;;  %347 = vrot.lane.b32.xlu0 %v798_v4, %s999_s25  ;;  %349 = vrot.lane.b32.xlu1 %v799_v5, %s999_s25  ;;  %v803_v8 = vld [vmem:[%s1101_s14 + $0x60] sm:$0xff]  ;;  %323 = vst.msk [vmem:[#allocation2 + $0x8] sm:$0xff] %vm321_vm0, %v798_v4  ;;  %324 = vst.msk [vmem:[#allocation2 + $0x10] sm:$0xff] %vm321_vm0, %v799_v5  ;;  %s376_s8 = scalar_lea.vmem %s290_s7, %s796_s29  ;;  %s878_s29 = smul.u32 42, %s1244_s15 }
  0x1d   : > { %v800_v7 = vld [vmem:[%s1101_s14 + $0x30] sm:$0xff]  ;;  %327 = vst.msk [vmem:[#allocation2 + $0x28] sm:$0xff] %vm321_vm0, %v802_v6  ;;  %v801_v9 = vld [vmem:[%s1101_s14 + $0x40] sm:$0xff]  ;;  %328 = vst.msk [vmem:[#allocation2 + $0x30] sm:$0xff] %vm321_vm0, %v803_v8 }
  0x1e   : > { %v314_v10 = vld [vmem:[%s1101_s14] sm:$0xff]  ;;  %325 = vst.msk [vmem:[#allocation2 + $0x18] sm:$0xff] %vm321_vm0, %v800_v7  ;;  %326 = vst.msk [vmem:[#allocation2 + $0x20] sm:$0xff] %vm321_vm0, %v801_v9  ;;  %v806_v15 = vld [vmem:[%s376_s8 + $0x10] sm:$0xff]  ;;  %s304_s12 = sadd.s32 %s878_s29, %s877_s10 }
  0x1f   : > { %322 = vst.msk [vmem:[#allocation2] sm:$0xff] %vm321_vm0, %v314_v10  ;;  %v377_v16 = vld [vmem:[%s376_s8] sm:$0xff]  ;;  %v810_v19 = vld [vmem:[%s376_s8 + $0x50] sm:$0xff]  ;;  %s306_s13 = sadd.s32 %s879_s11, %s304_s12 }
  0x20   : > { %355 = vrot.lane.b32.xlu0 %v802_v6, %s999_s25  ;;  %435 = vrot.lane.b32.xlu1 %v806_v15, %s1002_s26  ;;  %v381_v17 = vld [vmem:[%s376_s8 + $0x40] sm:$0xff]  ;;  %v808_v20 = vld [vmem:[%s376_s8 + $0x30] sm:$0xff] }
  0x21   : > { %v807_v18 = vld [vmem:[%s376_s8 + $0x20] sm:$0xff]  ;;  %v804_v22 = vld [vmem:[%s1101_s14 + $0x70] sm:$0xff]  ;;  %s795_s14 = sshll.u32 %s306_s13, 3 }
  0x22   : > { %v811_v21 = vld [vmem:[%s376_s8 + $0x60] sm:$0xff]  ;;  %v812_v23 = vld [vmem:[%s376_s8 + $0x70] sm:$0xff]  ;;  %s308_s5 = scalar_lea.vmem %s1221_s4, %s795_s14 }
  0x24   : > { %391 = vrot.lane.b32.xlu0 %v377_v16, %s1003_s9  ;;  %393 = vrot.lane.b32.xlu1 %v806_v15, %s1003_s9 }
  0x28   : > { %399 = vrot.lane.b32.xlu0 %v381_v17, %s1003_s9  ;;  %437 = vrot.lane.b32.xlu1 %v807_v18, %s1002_s26 }
  0x2c   : > { %443 = vrot.lane.b32.xlu0 %v810_v19, %s1002_s26  ;;  %351 = vrot.lane.b32.xlu1 %v800_v7, %s999_s25 }
  0x30   : > { %357 = vrot.lane.b32.xlu0 %v803_v8, %s999_s25  ;;  %395 = vrot.lane.b32.xlu1 %v807_v18, %s1003_s9 }
  0x34   : > { %401 = vrot.lane.b32.xlu0 %v810_v19, %s1003_s9  ;;  %439 = vrot.lane.b32.xlu1 %v808_v20, %s1002_s26 }
  0x38   : > { %445 = vrot.lane.b32.xlu0 %v811_v21, %s1002_s26  ;;  %353 = vrot.lane.b32.xlu1 %v801_v9, %s999_s25 }
  0x3c   : > { %359 = vrot.lane.b32.xlu0 %v804_v22, %s999_s25  ;;  %397 = vrot.lane.b32.xlu1 %v808_v20, %s1003_s9 }
  0x40   : > { %403 = vrot.lane.b32.xlu0 %v811_v21, %s1003_s9  ;;  %441 = vrot.lane.b32.xlu1 %v381_v17, %s1002_s26 }
  0x44   : > { %447 = vrot.lane.b32.xlu0 %v812_v23, %s1002_s26 }
  0x8e   : > { %v348_v24 = vpop.permute.xlu0 %347  ;;  %v350_v25 = vpop.permute.xlu1 %349 }
  0x8f   : > { %369 = vst.msk [vmem:[#allocation2] sm:$0xff] %vm368_vm2, %v348_v24  ;;  %370 = vst.msk [vmem:[#allocation2 + $0x8] sm:$0xff] %vm368_vm2, %v350_v25 }
  0x92   : > { %v356_v26 = vpop.permute.xlu0 %355  ;;  %v436_v27 = vpop.permute.xlu1 %435 }
  0x93   : > { %373 = vst.msk [vmem:[#allocation2 + $0x20] sm:$0xff] %vm368_vm2, %v356_v26 }
  0x96   : > { %v392_v28 = vpop.permute.xlu0 %391  ;;  %v394_v29 = vpop.permute.xlu1 %393 }
  0x97   : > { %413 = vst.msk [vmem:[#allocation2] sm:$0xff] %vm412_vm3, %v392_v28  ;;  %414 = vst.msk [vmem:[#allocation2 + $0x8] sm:$0xff] %vm412_vm3, %v394_v29 }
  0x98   : > { %457 = vst.msk [vmem:[#allocation2] sm:$0xff] %vm456_vm4, %v436_v27 }
  0x9a   : > { %v400_v30 = vpop.permute.xlu0 %399  ;;  %v438_v31 = vpop.permute.xlu1 %437 }
  0x9b   : > { %417 = vst.msk [vmem:[#allocation2 + $0x20] sm:$0xff] %vm412_vm3, %v400_v30 }
  0x9c   : > { %458 = vst.msk [vmem:[#allocation2 + $0x8] sm:$0xff] %vm456_vm4, %v438_v31 }
  0x9e   : > { %v444_v32 = vpop.permute.xlu0 %443  ;;  %v352_v34 = vpop.permute.xlu1 %351 }
  0x9f   : > { %461 = vst.msk [vmem:[#allocation2 + $0x20] sm:$0xff] %vm456_vm4, %v444_v32  ;;  %v464_v33 = vld [vmem:[#allocation2] sm:$0xff] }
  0xa0   : > { %844 = vmatmul.mubr.msk.f32.vlgmr.msra.gmra.mrb[0].mxu0 %vm484_vm5, %v464_v33  ;;  %371 = vst.msk [vmem:[#allocation2 + $0x10] sm:$0xff] %vm368_vm2, %v352_v34 }
  0xa1   : > { %846 = vmatprep.mubr.msk.f32.mxu0 %vm1000_vm1, %v1001_v14 }
  0xa2   : > { %v358_v35 = vpop.permute.xlu0 %357  ;;  %v396_v36 = vpop.permute.xlu1 %395 }
  0xa3   : > { %374 = vst.msk [vmem:[#allocation2 + $0x28] sm:$0xff] %vm368_vm2, %v358_v35  ;;  %v465_v38 = vld [vmem:[#allocation2 + $0x8] sm:$0xff] }
  0xa4   : > { %415 = vst.msk [vmem:[#allocation2 + $0x10] sm:$0xff] %vm412_vm3, %v396_v36  ;;  %847 = vmatmul.mubr.msk.f32.gmra.mrb[2].mxu0 %vm484_vm5, %v465_v38 }
  0xa5   : > { %849 = vmatprep.mubr.msk.f32.mxu0 %vm1000_vm1, %v1001_v14 }
  0xa6   : > { %v402_v37 = vpop.permute.xlu0 %401  ;;  %v468_v39 = vld [vmem:[#allocation2 + $0x20] sm:$0xff]  ;;  %v440_v40 = vpop.permute.xlu1 %439 }
  0xa7   : > { %418 = vst.msk [vmem:[#allocation2 + $0x28] sm:$0xff] %vm412_vm3, %v402_v37  ;;  %856 = vmatmul.mubr.msk.f32.vlgmr.msra.gmra.mrb[0].mxu1 %vm484_vm5, %v468_v39 }
  0xa8   : > { %858 = vmatprep.mubr.msk.f32.mxu1 %vm1000_vm1, %v1001_v14  ;;  %459 = vst.msk [vmem:[#allocation2 + $0x10] sm:$0xff] %vm456_vm4, %v440_v40 }
  0xaa   : > { %v446_v41 = vpop.permute.xlu0 %445  ;;  %v354_v42 = vpop.permute.xlu1 %353 }
  0xab   : > { %462 = vst.msk [vmem:[#allocation2 + $0x28] sm:$0xff] %vm456_vm4, %v446_v41 }
  0xac   : > { %372 = vst.msk [vmem:[#allocation2 + $0x18] sm:$0xff] %vm368_vm2, %v354_v42 }
  0xae   : > { %v360_v43 = vpop.permute.xlu0 %359  ;;  %v398_v44 = vpop.permute.xlu1 %397 }
  0xaf   : > { %375 = vst.msk [vmem:[#allocation2 + $0x30] sm:$0xff] %vm368_vm2, %v360_v43  ;;  %v466_v46 = vld [vmem:[#allocation2 + $0x10] sm:$0xff] }
  0xb0   : > { %416 = vst.msk [vmem:[#allocation2 + $0x18] sm:$0xff] %vm412_vm3, %v398_v44  ;;  %850 = vmatmul.mubr.msk.f32.gmra.mrb[4].mxu0 %vm484_vm5, %v466_v46 }
  0xb1   : > { %852 = vmatprep.mubr.msk.f32.mxu0 %vm1000_vm1, %v1001_v14 }
  0xb2   : > { %v404_v45 = vpop.permute.xlu0 %403  ;;  %v469_v47 = vld [vmem:[#allocation2 + $0x28] sm:$0xff]  ;;  %v442_v48 = vpop.permute.xlu1 %441 }
  0xb3   : > { %419 = vst.msk [vmem:[#allocation2 + $0x30] sm:$0xff] %vm412_vm3, %v404_v45  ;;  %859 = vmatmul.mubr.msk.f32.gmra.mrb[2].mxu1 %vm484_vm5, %v469_v47 }
  0xb4   : > { %861 = vmatprep.mubr.msk.f32.mxu1 %vm1000_vm1, %v1001_v14  ;;  %460 = vst.msk [vmem:[#allocation2 + $0x18] sm:$0xff] %vm456_vm4, %v442_v48 }
  0xb6   : > { %v448_v49 = vpop.permute.xlu0 %447 }
  0xb7   : > { %463 = vst.msk [vmem:[#allocation2 + $0x30] sm:$0xff] %vm456_vm4, %v448_v49 }
  0xbb   : > { %v467_v50 = vld [vmem:[#allocation2 + $0x18] sm:$0xff] }
  0xbc   : > { %853 = vmatmul.mubr.msk.f32.gmra.mrb[6].mxu0 %vm484_vm5, %v467_v50 }
  0xbe   : > { %v470_v51 = vld [vmem:[#allocation2 + $0x30] sm:$0xff] }
  0xbf   : > { %862 = vmatmul.mubr.msk.f32.gmra.mrb[4].mxu1 %vm484_vm5, %v470_v51 }
 0x173   : > { %v572_v53 = vpop.f32.mrb[0].mxu0 }
 0x174   : > { %v573_v54 = vadd.f32 %v814_v52, %v572_v53  ;;  %v845_v55 = vpop.f32.mrb[1].mxu0 }
 0x176   : > { %606 = vst.msk [vmem:[%s308_s5] sm:$0xff] %vm321_vm0, %v573_v54 }
 0x177   : > { %v577_v56 = vpop.f32.mrb[2].mxu0 }
 0x178   : > { %v578_v58 = vadd.f32 %v814_v52, %v577_v56  ;;  %v848_v59 = vpop.f32.mrb[3].mxu0 }
 0x17a   : > { %v592_v57 = vpop.f32.mrb[0].mxu1  ;;  %607 = vst.msk [vmem:[%s308_s5 + $0x8] sm:$0xff] %vm321_vm0, %v578_v58 }
 0x17b   : > { %v593_v60 = vadd.f32 %v814_v52, %v592_v57  ;;  %v857_v61 = vpop.f32.mrb[1].mxu1 }
 0x17d   : > { %610 = vst.msk [vmem:[%s308_s5 + $0x20] sm:$0xff] %vm321_vm0, %v593_v60 }
 0x183   : > { %v582_v62 = vpop.f32.mrb[4].mxu0 }
 0x184   : > { %v583_v0 = vadd.f32 %v814_v52, %v582_v62  ;;  %v851_v1 = vpop.f32.mrb[5].mxu0 }
 0x186   : > { %v597_v63 = vpop.f32.mrb[2].mxu1  ;;  %608 = vst.msk [vmem:[%s308_s5 + $0x10] sm:$0xff] %vm321_vm0, %v583_v0 }
 0x187   : > { %v598_v2 = vadd.f32 %v814_v52, %v597_v63  ;;  %v860_v3 = vpop.f32.mrb[3].mxu1 }
 0x189   : > { %611 = vst.msk [vmem:[%s308_s5 + $0x28] sm:$0xff] %vm321_vm0, %v598_v2 }
 0x18f   : > { %v587_v4 = vpop.f32.mrb[6].mxu0 }
 0x190   : > { %v588_v6 = vadd.f32 %v814_v52, %v587_v4  ;;  %v854_v7 = vpop.f32.mrb[7].mxu0 }
 0x192   : > { %v602_v5 = vpop.f32.mrb[4].mxu1  ;;  %609 = vst.msk [vmem:[%s308_s5 + $0x18] sm:$0xff] %vm321_vm0, %v588_v6 }
 0x193   : > { %v603_v8 = vadd.f32 %v814_v52, %v602_v5  ;;  %v863_v9 = vpop.f32.mrb[5].mxu1 }
 0x195   : > { %612 = vst.msk [vmem:[%s308_s5 + $0x30] sm:$0xff] %vm321_vm0, %v603_v8 }
 0x196 PF: > { %s14_s21 = sadd.s32 1, %s996_s21   ;;  %s1223_s15 = smov %s984_s18 }
 0x197   : > { %p11_p11 = scmp.ge.s32.totalorder %s14_s21, 26   ;;  %s1224_s16 = smov %s988_s19 }
 0x198   : > { %s1225_s17 = smov %s992_s20  ;;  %s1226_s18 = smov %s1230_s22 }
 0x199   : > { %s1227_s19 = smov %s1234_s23  ;;  %s1228_s20 = smov %s1238_s24 }
 0x19a   :  { %13 = sbr.rel (!%p11_p11) target bundleno = 4 (0x4), region = 74 }

// kernel: conv_transpose3d_pallas.5
= control target key start
LH: loop header
LB: loop body
LE: loop exit
PB: predicated region body
PF: predicated region fallthrough
CT: control target
= control target key end

     0   :  { %s921_s12 = smov 0   ;;  %s923_s13 = smov 0   ;;  %s1100_s0 = inlined_call_operand.vmem [shape: f32[2,7,9,9,8], index: 0, kind: input, shape index: {}]   ;;  %s1101_s1 = inlined_call_operand.vmem [shape: f32[2,32,8], index: 1, kind: input, shape index: {}]   ;;  %s1102_s2 = inlined_call_operand.vmem [shape: f32[1,8], index: 2, kind: input, shape index: {}]   ;;  %s1103_s3 = inlined_call_operand.vmem [shape: f32[2,2,6,7,8,8], index: 3, kind: output, shape index: {}]  }
   0x1   :  { %s925_s14 = smov 0   ;;  %s927_s15 = smov 0  }
   0x2   :  { %s929_s16 = smov 0   ;;  %s931_s17 = smov 0  }
   0x3   :  { %s933_s18 = smov 0  }
   0x4 LB: > { %s28_s19 = sadd.s32 1, %s881_s15  ;;  %s35_s20 = sadd.s32 1, %s885_s16  ;;  %s893_s18 = sphi %s933_s18, %s13_s18   ;;  %s889_s17 = sphi %s931_s17, %s1109_s17   ;;  %s885_s16 = sphi %s929_s16, %s1108_s16   ;;  %s881_s15 = sphi %s927_s15, %s1107_s15   ;;  %s877_s14 = sphi %s925_s14, %s1106_s14   ;;  %s873_s13 = sphi %s923_s13, %s1105_s13   ;;  %s869_s12 = sphi %s921_s12, %s1104_s12  }
   0x5   : > { %p29_p0 = scmp.ge.s32.totalorder %s28_s19, 2  ;;  %p692_p1 = scmp.ge.s32.totalorder %s893_s18, 1 }
   0x6   : > { %p175_p2 = scmp.lt.s32.totalorder %s893_s18, 25  ;;  %s39_s21 = sadd.s32 1, %s889_s17 }
   0x7   : > { %s1111_s19 = smov (%p29_p0, %s28_s19), 0  ;;  %s1113_s20 = smov (!%p29_p0, %s35_s20), %s885_s16 }
   0x8   : > { %p176_p3 = pnand %p692_p1, %p175_p2  ;;  %p37_p4 = scmp.ge.s32.totalorder %s1113_s20, 6 }
   0x9   : > { %p215_p6 = scmp.lt.s32.totalorder (!%p176_p3), %s877_s14, 1  ;;  %p217_p7 = scmp.lt.s32.totalorder (!%p176_p3), %s873_s13, 6  ;;  %v895_v0 = vmov (!%p176_p3), 0.0|0.0   ;;  %vm253_vm0 = vcmask (!%p176_p3), 64512   ;;  %vm896_vm1 = vmmov (!%p176_p3), 0   ;;  %v897_v10 = vmov (!%p176_p3), 0.0  }
   0xa   : > { %s1115_s20 = smov (%p37_p4, %s1113_s20), 0  ;;  %s1117_s21 = smov (!%p37_p4, %s39_s21), %s889_s17 }
   0xb   : > { %p41_p5 = scmp.ge.s32.totalorder %s1117_s21, 2  ;;  %179 = sbr.rel (%p176_p3) target bundleno = 406 (0x196), region = 32  ;;  %762 = vmatprep.subr.bf16.mxu0 (!%p176_p3), %v895_v0  ;;  %768 = vmatprep.subr.bf16.mxu1 (!%p176_p3), %v895_v0  ;;  %vm296_vm2 = vcmask (!%p176_p3), 130112   ;;  %vm343_vm3 = vcmask (!%p176_p3), 195712   ;;  %vm386_vm4 = vcmask (!%p176_p3), 261312   ;;  %vm414_vm5 = vcmask (!%p176_p3), 261120  }
   0xc   : > { %s695_s25 = sshll.u32 (!%p176_p3), %s869_s12, 4  ;;  %s711_s26 = sshll.u32 (!%p176_p3), %s869_s12, 5  ;;  %741 = vmatprep.mubr.msk.f32.mxu0 (!%p176_p3), %vm896_vm1, %v897_v10  ;;  %753 = vmatprep.mubr.msk.f32.mxu1 (!%p176_p3), %vm896_vm1, %v897_v10  ;;  %v712_v52 = vld [vmem:[%s1102_s2] ss:$0 sm:$0xff] (!%p176_p3) }
   0xd   : > { %s1119_s21 = smov (%p41_p5, %s1117_s21), 0  ;;  %s402_s30 = scalar_lea.vmem (!%p176_p3), %s1101_s1, %s711_s26 }
   0xe   : > { %v403_v1 = vld [vmem:[%s402_s30] sm:$0xff] (!%p176_p3)  ;;  %v404_v2 = vld [vmem:[%s402_s30 + $0x8] sm:$0xff] (!%p176_p3)  ;;  %v405_v3 = vld [vmem:[%s402_s30 + $0x10] sm:$0xff] (!%p176_p3)  ;;  %s898_s9 = smov (!%p176_p3), 8   ;;  %s899_s10 = smov (!%p176_p3), 24  }
   0xf   : > { %v763_v4 = vpack.c.bf16 (!%p176_p3), %v404_v2, %v403_v1  ;;  %v406_v5 = vld [vmem:[%s402_s30 + $0x18] sm:$0xff] (!%p176_p3)  ;;  %s900_s11 = smov (!%p176_p3), 16   ;;  %p227_p8 = scmp.lt.s32.totalorder (!%p176_p3), %s869_s12, 1 }
  0x10   : > { %v766_v9 = vpack.c.bf16 (!%p176_p3), %v406_v5, %v405_v3  ;;  %p229_p9 = scmp.lt.s32.totalorder (!%p176_p3), %s873_s13, 5 }
  0x11   : > { %764 = vmatpush3.bf16.msra.mxu0 (!%p176_p3), %v763_v4  ;;  %770 = vmatpush3.bf16.msra.mxu1 (!%p176_p3), %v763_v4 }
  0x12   : > { %s1121_s14 = smov (!%p215_p6, %s877_s14), 1  ;;  %765 = vmatprep.subr.bf16.mxu0 %v895_v0  ;;  %769 = vmatprep.subr.bf16.mxu1 %v895_v0  ;;  %s1123_s12 = smov (!%p227_p8, %s869_s12), 1 }
  0x13   : > { %s218_s22 = scalar_select %p217_p7, %s873_s13, 6 }
  0x14   : > { %s773_s23 = smul.u32 126, %s1121_s14  ;;  %s1125_s13 = smov (!%p229_p9, %s873_s13), 5 }
  0x15   : > { %s772_s24 = smul.u32 18, %s218_s22  ;;  %767 = vmatpush3.bf16.msra.mxu0 %v766_v9  ;;  %771 = vmatpush3.bf16.msra.mxu1 %v766_v9 }
  0x16   : > { %s775_s22 = smul.u32 42, %s1123_s12 }
  0x17   : > { %s221_s27 = sadd.s32 %s773_s23, %s772_s24  ;;  %s774_s23 = smul.u32 7, %s1125_s13 }
  0x18   : > { %s693_s4 = sshll.u32 %s221_s27, 3  ;;  %s776_s24 = smul.u32 84, %s1121_s14 }
  0x19   : > { %s223_s7 = scalar_lea.vmem %s1100_s0, %s693_s4 }
  0x1a   : > { %s980_s8 = scalar_lea.vmem %s223_s7, %s695_s25  ;;  %s236_s25 = sadd.s32 %s775_s22, %s774_s23 }
  0x1b   : > { %v261_v6 = vld [vmem:[%s980_s8 + $0x1] sm:$0xff]  ;;  %v704_v7 = vld [vmem:[%s980_s8 + $0x11] sm:$0xff]  ;;  %s238_s26 = sadd.s32 %s776_s24, %s236_s25 }
  0x1c   : > { %v697_v8 = vld [vmem:[%s980_s8 + $0x10] sm:$0xff]  ;;  %275 = vrot.lane.b32.xlu0 %v261_v6, %s898_s9  ;;  %365 = vrot.lane.b32.xlu1 %v704_v7, %s899_s10  ;;  %v698_v11 = vld [vmem:[%s980_s8 + $0x20] sm:$0xff]  ;;  %s694_s27 = sshll.u32 %s238_s26, 3 }
  0x1d   : > { %255 = vst.msk [vmem:[#allocation2 + $0x8] sm:$0xff] %vm253_vm0, %v697_v8  ;;  %v701_v12 = vld [vmem:[%s980_s8 + $0x50] sm:$0xff]  ;;  %256 = vst.msk [vmem:[#allocation2 + $0x10] sm:$0xff] %vm253_vm0, %v698_v11  ;;  %v702_v14 = vld [vmem:[%s980_s8 + $0x60] sm:$0xff]  ;;  %s240_s5 = scalar_lea.vmem %s1103_s3, %s694_s27 }
  0x1e   : > { %v699_v13 = vld [vmem:[%s980_s8 + $0x30] sm:$0xff]  ;;  %259 = vst.msk [vmem:[#allocation2 + $0x28] sm:$0xff] %vm253_vm0, %v701_v12  ;;  %v700_v15 = vld [vmem:[%s980_s8 + $0x40] sm:$0xff]  ;;  %260 = vst.msk [vmem:[#allocation2 + $0x30] sm:$0xff] %vm253_vm0, %v702_v14 }
  0x1f   : > { %257 = vst.msk [vmem:[#allocation2 + $0x18] sm:$0xff] %vm253_vm0, %v699_v13  ;;  %v246_v16 = vld [vmem:[%s980_s8] sm:$0xff]  ;;  %258 = vst.msk [vmem:[#allocation2 + $0x20] sm:$0xff] %vm253_vm0, %v700_v15  ;;  %v708_v19 = vld [vmem:[%s980_s8 + $0x51] sm:$0xff] }
  0x20   : > { %322 = vrot.lane.b32.xlu0 %v697_v8, %s900_s11  ;;  %277 = vrot.lane.b32.xlu1 %v704_v7, %s898_s9  ;;  %v265_v17 = vld [vmem:[%s980_s8 + $0x41] sm:$0xff]  ;;  %254 = vst.msk [vmem:[#allocation2] sm:$0xff] %vm253_vm0, %v246_v16  ;;  %v706_v20 = vld [vmem:[%s980_s8 + $0x31] sm:$0xff] }
  0x21   : > { %v705_v18 = vld [vmem:[%s980_s8 + $0x21] sm:$0xff]  ;;  %v703_v22 = vld [vmem:[%s980_s8 + $0x70] sm:$0xff] }
  0x22   : > { %v709_v21 = vld [vmem:[%s980_s8 + $0x61] sm:$0xff]  ;;  %v710_v23 = vld [vmem:[%s980_s8 + $0x71] sm:$0xff] }
  0x24   : > { %283 = vrot.lane.b32.xlu0 %v265_v17, %s898_s9  ;;  %324 = vrot.lane.b32.xlu1 %v698_v11, %s900_s11 }
  0x28   : > { %330 = vrot.lane.b32.xlu0 %v701_v12, %s900_s11  ;;  %367 = vrot.lane.b32.xlu1 %v705_v18, %s899_s10 }
  0x2c   : > { %373 = vrot.lane.b32.xlu0 %v708_v19, %s899_s10  ;;  %279 = vrot.lane.b32.xlu1 %v705_v18, %s898_s9 }
  0x30   : > { %285 = vrot.lane.b32.xlu0 %v708_v19, %s898_s9  ;;  %326 = vrot.lane.b32.xlu1 %v699_v13, %s900_s11 }
  0x34   : > { %332 = vrot.lane.b32.xlu0 %v702_v14, %s900_s11  ;;  %369 = vrot.lane.b32.xlu1 %v706_v20, %s899_s10 }
  0x38   : > { %375 = vrot.lane.b32.xlu0 %v709_v21, %s899_s10  ;;  %281 = vrot.lane.b32.xlu1 %v706_v20, %s898_s9 }
  0x3c   : > { %287 = vrot.lane.b32.xlu0 %v709_v21, %s898_s9  ;;  %328 = vrot.lane.b32.xlu1 %v700_v15, %s900_s11 }
  0x40   : > { %334 = vrot.lane.b32.xlu0 %v703_v22, %s900_s11  ;;  %371 = vrot.lane.b32.xlu1 %v265_v17, %s899_s10 }
  0x44   : > { %377 = vrot.lane.b32.xlu0 %v710_v23, %s899_s10 }
  0x8e   : > { %v276_v24 = vpop.permute.xlu0 %275  ;;  %v366_v25 = vpop.permute.xlu1 %365 }
  0x8f   : > { %297 = vst.msk [vmem:[#allocation2] sm:$0xff] %vm296_vm2, %v276_v24 }
  0x92   : > { %v323_v26 = vpop.permute.xlu0 %322  ;;  %v278_v27 = vpop.permute.xlu1 %277 }
  0x93   : > { %344 = vst.msk [vmem:[#allocation2] sm:$0xff] %vm343_vm3, %v323_v26 }
  0x94   : > { %298 = vst.msk [vmem:[#allocation2 + $0x8] sm:$0xff] %vm296_vm2, %v278_v27 }
  0x95   : > { %387 = vst.msk [vmem:[#allocation2] sm:$0xff] %vm386_vm4, %v366_v25 }
  0x96   : > { %v284_v28 = vpop.permute.xlu0 %283  ;;  %v325_v29 = vpop.permute.xlu1 %324 }
  0x97   : > { %301 = vst.msk [vmem:[#allocation2 + $0x20] sm:$0xff] %vm296_vm2, %v284_v28 }
  0x98   : > { %345 = vst.msk [vmem:[#allocation2 + $0x8] sm:$0xff] %vm343_vm3, %v325_v29 }
  0x9a   : > { %v331_v30 = vpop.permute.xlu0 %330  ;;  %v368_v31 = vpop.permute.xlu1 %367 }
  0x9b   : > { %348 = vst.msk [vmem:[#allocation2 + $0x20] sm:$0xff] %vm343_vm3, %v331_v30 }
  0x9c   : > { %v394_v32 = vld [vmem:[#allocation2] sm:$0xff]  ;;  %388 = vst.msk [vmem:[#allocation2 + $0x8] sm:$0xff] %vm386_vm4, %v368_v31 }
  0x9d   : > { %742 = vmatmul.mubr.msk.f32.vlgmr.msra.gmra.mrb[0].mxu0 %vm414_vm5, %v394_v32 }
  0x9e   : > { %744 = vmatprep.mubr.msk.f32.mxu0 %vm896_vm1, %v897_v10  ;;  %v374_v33 = vpop.permute.xlu0 %373  ;;  %v280_v34 = vpop.permute.xlu1 %279 }
  0x9f   : > { %391 = vst.msk [vmem:[#allocation2 + $0x20] sm:$0xff] %vm386_vm4, %v374_v33 }
  0xa0   : > { %299 = vst.msk [vmem:[#allocation2 + $0x10] sm:$0xff] %vm296_vm2, %v280_v34 }
  0xa2   : > { %v286_v35 = vpop.permute.xlu0 %285  ;;  %v327_v36 = vpop.permute.xlu1 %326 }
  0xa3   : > { %v395_v37 = vld [vmem:[#allocation2 + $0x8] sm:$0xff]  ;;  %302 = vst.msk [vmem:[#allocation2 + $0x28] sm:$0xff] %vm296_vm2, %v286_v35 }
  0xa4   : > { %346 = vst.msk [vmem:[#allocation2 + $0x10] sm:$0xff] %vm343_vm3, %v327_v36  ;;  %745 = vmatmul.mubr.msk.f32.gmra.mrb[2].mxu0 %vm414_vm5, %v395_v37 }
  0xa5   : > { %747 = vmatprep.mubr.msk.f32.mxu0 %vm896_vm1, %v897_v10 }
  0xa6   : > { %v333_v38 = vpop.permute.xlu0 %332  ;;  %v398_v39 = vld [vmem:[#allocation2 + $0x20] sm:$0xff]  ;;  %v370_v40 = vpop.permute.xlu1 %369 }
  0xa7   : > { %349 = vst.msk [vmem:[#allocation2 + $0x28] sm:$0xff] %vm343_vm3, %v333_v38  ;;  %754 = vmatmul.mubr.msk.f32.vlgmr.msra.gmra.mrb[0].mxu1 %vm414_vm5, %v398_v39 }
  0xa8   : > { %389 = vst.msk [vmem:[#allocation2 + $0x10] sm:$0xff] %vm386_vm4, %v370_v40  ;;  %756 = vmatprep.mubr.msk.f32.mxu1 %vm896_vm1, %v897_v10 }
  0xaa   : > { %v376_v41 = vpop.permute.xlu0 %375  ;;  %v282_v42 = vpop.permute.xlu1 %281 }
  0xab   : > { %392 = vst.msk [vmem:[#allocation2 + $0x28] sm:$0xff] %vm386_vm4, %v376_v41 }
  0xac   : > { %300 = vst.msk [vmem:[#allocation2 + $0x18] sm:$0xff] %vm296_vm2, %v282_v42 }
  0xae   : > { %v288_v43 = vpop.permute.xlu0 %287  ;;  %v329_v44 = vpop.permute.xlu1 %328 }
  0xaf   : > { %v396_v45 = vld [vmem:[#allocation2 + $0x10] sm:$0xff]  ;;  %303 = vst.msk [vmem:[#allocation2 + $0x30] sm:$0xff] %vm296_vm2, %v288_v43 }
  0xb0   : > { %347 = vst.msk [vmem:[#allocation2 + $0x18] sm:$0xff] %vm343_vm3, %v329_v44  ;;  %748 = vmatmul.mubr.msk.f32.gmra.mrb[4].mxu0 %vm414_vm5, %v396_v45 }
  0xb1   : > { %750 = vmatprep.mubr.msk.f32.mxu0 %vm896_vm1, %v897_v10 }
  0xb2   : > { %v335_v46 = vpop.permute.xlu0 %334  ;;  %v399_v47 = vld [vmem:[#allocation2 + $0x28] sm:$0xff]  ;;  %v372_v48 = vpop.permute.xlu1 %371 }
  0xb3   : > { %350 = vst.msk [vmem:[#allocation2 + $0x30] sm:$0xff] %vm343_vm3, %v335_v46  ;;  %757 = vmatmul.mubr.msk.f32.gmra.mrb[2].mxu1 %vm414_vm5, %v399_v47 }
  0xb4   : > { %390 = vst.msk [vmem:[#allocation2 + $0x18] sm:$0xff] %vm386_vm4, %v372_v48  ;;  %759 = vmatprep.mubr.msk.f32.mxu1 %vm896_vm1, %v897_v10 }
  0xb6   : > { %v378_v49 = vpop.permute.xlu0 %377 }
  0xb7   : > { %393 = vst.msk [vmem:[#allocation2 + $0x30] sm:$0xff] %vm386_vm4, %v378_v49 }
  0xbb   : > { %v397_v50 = vld [vmem:[#allocation2 + $0x18] sm:$0xff] }
  0xbc   : > { %751 = vmatmul.mubr.msk.f32.gmra.mrb[6].mxu0 %vm414_vm5, %v397_v50 }
  0xbe   : > { %v400_v51 = vld [vmem:[#allocation2 + $0x30] sm:$0xff] }
  0xbf   : > { %760 = vmatmul.mubr.msk.f32.gmra.mrb[4].mxu1 %vm414_vm5, %v400_v51 }
 0x170   : > { %v502_v53 = vpop.f32.mrb[0].mxu0 }
 0x171   : > { %v503_v54 = vadd.f32 %v712_v52, %v502_v53  ;;  %v743_v55 = vpop.f32.mrb[1].mxu0 }
 0x173   : > { %536 = vst.msk [vmem:[%s240_s5] sm:$0xff] %vm253_vm0, %v503_v54 }
 0x177   : > { %v507_v56 = vpop.f32.mrb[2].mxu0 }
 0x178   : > { %v508_v57 = vadd.f32 %v712_v52, %v507_v56  ;;  %v746_v58 = vpop.f32.mrb[3].mxu0 }
 0x17a   : > { %537 = vst.msk [vmem:[%s240_s5 + $0x8] sm:$0xff] %vm253_vm0, %v508_v57  ;;  %v522_v59 = vpop.f32.mrb[0].mxu1 }
 0x17b   : > { %v523_v60 = vadd.f32 %v712_v52, %v522_v59  ;;  %v755_v61 = vpop.f32.mrb[1].mxu1 }
 0x17d   : > { %540 = vst.msk [vmem:[%s240_s5 + $0x20] sm:$0xff] %vm253_vm0, %v523_v60 }
 0x183   : > { %v512_v62 = vpop.f32.mrb[4].mxu0 }
 0x184   : > { %v513_v63 = vadd.f32 %v712_v52, %v512_v62  ;;  %v749_v0 = vpop.f32.mrb[5].mxu0 }
 0x186   : > { %538 = vst.msk [vmem:[%s240_s5 + $0x10] sm:$0xff] %vm253_vm0, %v513_v63  ;;  %v527_v1 = vpop.f32.mrb[2].mxu1 }
 0x187   : > { %v528_v2 = vadd.f32 %v712_v52, %v527_v1  ;;  %v758_v3 = vpop.f32.mrb[3].mxu1 }
 0x189   : > { %541 = vst.msk [vmem:[%s240_s5 + $0x28] sm:$0xff] %vm253_vm0, %v528_v2 }
 0x18f   : > { %v517_v4 = vpop.f32.mrb[6].mxu0 }
 0x190   : > { %v518_v5 = vadd.f32 %v712_v52, %v517_v4  ;;  %v752_v6 = vpop.f32.mrb[7].mxu0 }
 0x192   : > { %539 = vst.msk [vmem:[%s240_s5 + $0x18] sm:$0xff] %vm253_vm0, %v518_v5  ;;  %v532_v7 = vpop.f32.mrb[4].mxu1 }
 0x193   : > { %v533_v8 = vadd.f32 %v712_v52, %v532_v7  ;;  %v761_v9 = vpop.f32.mrb[5].mxu1 }
 0x195   : > { %542 = vst.msk [vmem:[%s240_s5 + $0x30] sm:$0xff] %vm253_vm0, %v533_v8 }
 0x196 PF: > { %s13_s18 = sadd.s32 1, %s893_s18   ;;  %s1104_s12 = smov %s881_s15 }
 0x197   : > { %p10_p10 = scmp.ge.s32.totalorder %s13_s18, 26   ;;  %s1105_s13 = smov %s885_s16 }
 0x198   : > { %s1106_s14 = smov %s889_s17  ;;  %s1107_s15 = smov %s1111_s19 }
 0x199   : > { %s1108_s16 = smov %s1115_s20  ;;  %s1109_s17 = smov %s1119_s21 }
 0x19a   :  { %12 = sbr.rel (!%p10_p10) target bundleno = 4 (0x4), region = 65 }

// kernel: conv_transpose3d_pallas.7
= control target key start
LH: loop header
LB: loop body
LE: loop exit
PB: predicated region body
PF: predicated region fallthrough
CT: control target
= control target key end

     0   :  { %s1249_s15 = smov 0   ;;  %s1251_s16 = smov 0   ;;  %s1547_s0 = inlined_call_operand.vmem [shape: f32[2,7,9,9,8], index: 0, kind: input, shape index: {}, may-alias: {0,1}]   ;;  %s1548_s1 = inlined_call_operand.vmem [shape: f32[2,7,9,9,8], index: 1, kind: input, shape index: {}, may-alias: {0,1}]   ;;  %s1549_s2 = inlined_call_operand.vmem [shape: f32[2,64,8], index: 2, kind: input, shape index: {}]   ;;  %s1550_s3 = inlined_call_operand.vmem [shape: f32[1,8], index: 3, kind: input, shape index: {}]   ;;  %s1551_s4 = inlined_call_operand.vmem [shape: f32[2,2,6,7,8,8], index: 4, kind: output, shape index: {}]  }
   0x1   :  { %s1253_s17 = smov 0   ;;  %s1255_s18 = smov 0  }
   0x2   :  { %s1257_s19 = smov 0   ;;  %s1259_s20 = smov 0  }
   0x3   :  { %s1261_s21 = smov 0  }
   0x4 LB: > { %s29_s22 = sadd.s32 1, %s1200_s18  ;;  %s36_s23 = sadd.s32 1, %s1204_s19  ;;  %s1212_s21 = sphi %s1261_s21, %s14_s21   ;;  %s1208_s20 = sphi %s1259_s20, %s1557_s20   ;;  %s1204_s19 = sphi %s1257_s19, %s1556_s19   ;;  %s1200_s18 = sphi %s1255_s18, %s1555_s18   ;;  %s1196_s17 = sphi %s1253_s17, %s1554_s17   ;;  %s1192_s16 = sphi %s1251_s16, %s1553_s16   ;;  %s1188_s15 = sphi %s1249_s15, %s1552_s15  }
   0x5   : > { %p30_p0 = scmp.ge.s32.totalorder %s29_s22, 2  ;;  %p968_p1 = scmp.ge.s32.totalorder %s1212_s21, 1 }
   0x6   : > { %p220_p2 = scmp.lt.s32.totalorder %s1212_s21, 25  ;;  %s40_s24 = sadd.s32 1, %s1208_s20 }
   0x7   : > { %s1559_s22 = smov (%p30_p0, %s29_s22), 0  ;;  %s1561_s23 = smov (!%p30_p0, %s36_s23), %s1204_s19 }
   0x8   : > { %p221_p3 = pnand %p968_p1, %p220_p2  ;;  %p38_p4 = scmp.ge.s32.totalorder %s1561_s23, 6 }
   0x9   : > { %p272_p6 = scmp.lt.s32.totalorder (!%p221_p3), %s1196_s17, 1  ;;  %p274_p7 = scmp.lt.s32.totalorder (!%p221_p3), %s1192_s16, 6  ;;  %vm321_vm0 = vcmask (!%p221_p3), 64512   ;;  %v1216_v9 = vmov (!%p221_p3), 0.0|0.0   ;;  %vm1221_vm1 = vmmov (!%p221_p3), 0   ;;  %v1222_v28 = vmov (!%p221_p3), 0.0  }
   0xa   : > { %s1563_s23 = smov (%p38_p4, %s1561_s23), 0  ;;  %s1565_s24 = smov (!%p38_p4, %s40_s24), %s1208_s20 }
   0xb   : > { %p42_p5 = scmp.ge.s32.totalorder %s1565_s24, 2  ;;  %224 = sbr.rel (%p221_p3) target bundleno = 462 (0x1ce), region = 36  ;;  %1066 = vmatprep.subr.bf16.mxu0 (!%p221_p3), %v1216_v9  ;;  %1078 = vmatprep.subr.bf16.mxu1 (!%p221_p3), %v1216_v9  ;;  %vm364_vm2 = vcmask (!%p221_p3), 130112   ;;  %vm411_vm3 = vcmask (!%p221_p3), 195712   ;;  %vm454_vm4 = vcmask (!%p221_p3), 261312   ;;  %vm498_vm5 = vcmask (!%p221_p3), 326912  }
   0xc   : > { %s972_s28 = sshll.u32 (!%p221_p3), %s1188_s15, 4  ;;  %s281_s29 = sadd.s32 (!%p221_p3), 1, %s1192_s16  ;;  %1045 = vmatprep.mubr.msk.f32.mxu0 (!%p221_p3), %vm1221_vm1, %v1222_v28  ;;  %1057 = vmatprep.mubr.msk.f32.mxu1 (!%p221_p3), %vm1221_vm1, %v1222_v28  ;;  %vm541_vm6 = vcmask (!%p221_p3), 392512   ;;  %vm585_vm7 = vcmask (!%p221_p3), 458112   ;;  %vm628_vm8 = vcmask (!%p221_p3), 523712   ;;  %vm660_vm9 = vcmask (!%p221_p3), 523264  }
   0xd   : > { %s1567_s24 = smov (%p42_p5, %s1565_s24), 0  ;;  %p284_p8 = scmp.lt.s32.totalorder (!%p221_p3), %s281_s29, 6 }
   0xe   : > { %s1214_s10 = smov (!%p221_p3), 24   ;;  %s1215_s11 = smov (!%p221_p3), 8  }
   0xf   : > { %s1003_s12 = sshll.u32 (!%p221_p3), %s1188_s15, 6  ;;  %s1223_s14 = smov (!%p221_p3), 56  }
  0x10   : > { %p295_p9 = scmp.lt.s32.totalorder (!%p221_p3), %s1188_s15, 1  ;;  %p297_p10 = scmp.lt.s32.totalorder (!%p221_p3), %s1192_s16, 5 }
  0x12   : > { %s1569_s17 = smov (!%p272_p6, %s1196_s17), 1  ;;  %s1571_s29 = smov (!%p284_p8, %s281_s29), 6 }
  0x13   : > { %s275_s25 = scalar_select %p274_p7, %s1192_s16, 6 }
  0x14   : > { %s1087_s26 = smul.u32 126, %s1569_s17  ;;  %s1573_s15 = smov (!%p295_p9, %s1188_s15), 1 }
  0x15   : > { %s1086_s27 = smul.u32 18, %s275_s25  ;;  %s1575_s16 = smov (!%p297_p10, %s1192_s16), 5 }
  0x16   : > { %s1088_s13 = smul.u32 18, %s1571_s29 }
  0x17   : > { %s278_s30 = sadd.s32 %s1087_s26, %s1086_s27  ;;  %s1333_s27 = scalar_lea.vmem %s1549_s2, %s1003_s12 }
  0x18   : > { %s969_s5 = sshll.u32 %s278_s30, 3  ;;  %s288_s29 = sadd.s32 %s1088_s13, %s1087_s26  ;;  %v645_v11 = vld [vmem:[%s1333_s27] sm:$0xff]  ;;  %v646_v12 = vld [vmem:[%s1333_s27 + $0x8] sm:$0xff]  ;;  %v647_v14 = vld [vmem:[%s1333_s27 + $0x10] sm:$0xff] }
  0x19   : > { %s280_s8 = scalar_lea.vmem %s1547_s0, %s969_s5  ;;  %s1217_s30 = smov 16   ;;  %v1067_v13 = vpack.c.bf16 %v646_v12, %v645_v11  ;;  %v648_v15 = vld [vmem:[%s1333_s27 + $0x18] sm:$0xff]  ;;  %v649_v20 = vld [vmem:[%s1333_s27 + $0x20] sm:$0xff]  ;;  %v650_v21 = vld [vmem:[%s1333_s27 + $0x28] sm:$0xff] }
  0x1a   : > { %s1309_s9 = scalar_lea.vmem %s280_s8, %s972_s28  ;;  %s970_s26 = sshll.u32 %s288_s29, 3  ;;  %v1070_v18 = vpack.c.bf16 %v648_v15, %v647_v14  ;;  %v1073_v22 = vpack.c.bf16 %v650_v21, %v649_v20  ;;  %v651_v23 = vld [vmem:[%s1333_s27 + $0x30] sm:$0xff]  ;;  %v652_v24 = vld [vmem:[%s1333_s27 + $0x38] sm:$0xff] }
  0x1b   : > { %v981_v0 = vld [vmem:[%s1309_s9 + $0x11] sm:$0xff]  ;;  %v329_v1 = vld [vmem:[%s1309_s9 + $0x1] sm:$0xff]  ;;  %s290_s7 = scalar_lea.vmem %s1548_s1, %s970_s26  ;;  %1068 = vmatpush3.bf16.msra.mxu0 %v1067_v13  ;;  %1082 = vmatpush3.bf16.msra.mxu1 %v1067_v13  ;;  %s1219_s12 = smov 40   ;;  %v1076_v27 = vpack.c.bf16 %v652_v24, %v651_v23 }
  0x1c   : > { %433 = vrot.lane.b32.xlu1 %v981_v0, %s1214_s10  ;;  %343 = vrot.lane.b32.xlu0 %v329_v1, %s1215_s11  ;;  %v974_v2 = vld [vmem:[%s1309_s9 + $0x10] sm:$0xff]  ;;  %v975_v3 = vld [vmem:[%s1309_s9 + $0x20] sm:$0xff]  ;;  %s1359_s8 = scalar_lea.vmem %s290_s7, %s972_s28  ;;  %s1218_s28 = smov 32  }
  0x1d   : > { %v1319_v4 = vld [vmem:[%s1309_s9 + $0x41] sm:$0xff]  ;;  %v978_v5 = vld [vmem:[%s1309_s9 + $0x50] sm:$0xff]  ;;  %323 = vst.msk [vmem:[#allocation2 + $0x8] sm:$0xff] %vm321_vm0, %v974_v2  ;;  %324 = vst.msk [vmem:[#allocation2 + $0x10] sm:$0xff] %vm321_vm0, %v975_v3  ;;  %1069 = vmatprep.subr.bf16.mxu0 %v1216_v9  ;;  %1079 = vmatprep.subr.bf16.mxu1 %v1216_v9  ;;  %s1220_s13 = smov 48  }
  0x1e   : > { %v1325_v6 = vld [vmem:[%s1309_s9 + $0x30] sm:$0xff]  ;;  %v1328_v7 = vld [vmem:[%s1309_s9 + $0x60] sm:$0xff]  ;;  %327 = vst.msk [vmem:[#allocation2 + $0x28] sm:$0xff] %vm321_vm0, %v978_v5 }
  0x1f   : > { %v1339_v8 = vld [vmem:[%s1309_s9 + $0x40] sm:$0xff]  ;;  %325 = vst.msk [vmem:[#allocation2 + $0x18] sm:$0xff] %vm321_vm0, %v1325_v6  ;;  %328 = vst.msk [vmem:[#allocation2 + $0x30] sm:$0xff] %vm321_vm0, %v1328_v7  ;;  %v989_v19 = vld [vmem:[%s1359_s8 + $0x10] sm:$0xff]  ;;  %1071 = vmatpush3.bf16.msra.mxu0 %v1070_v18  ;;  %1083 = vmatpush3.bf16.msra.mxu1 %v1070_v18 }
  0x20   : > { %351 = vrot.lane.b32.xlu1 %v1319_v4, %s1215_s11  ;;  %390 = vrot.lane.b32.xlu0 %v974_v2, %s1217_s30  ;;  %v314_v10 = vld [vmem:[%s1309_s9] sm:$0xff]  ;;  %326 = vst.msk [vmem:[#allocation2 + $0x20] sm:$0xff] %vm321_vm0, %v1339_v8  ;;  %v985_v26 = vld [vmem:[%s1309_s9 + $0x51] sm:$0xff] }
  0x21   : > { %322 = vst.msk [vmem:[#allocation2] sm:$0xff] %vm321_vm0, %v314_v10  ;;  %v463_v16 = vld [vmem:[%s1359_s8] sm:$0xff]  ;;  %1072 = vmatprep.subr.bf16.mxu0 %v1216_v9  ;;  %1080 = vmatprep.subr.bf16.mxu1 %v1216_v9  ;;  %v996_v29 = vld [vmem:[%s1359_s8 + $0x11] sm:$0xff] }
  0x22   : > { %v506_v17 = vld [vmem:[%s1359_s8 + $0x1] sm:$0xff]  ;;  %v993_v33 = vld [vmem:[%s1359_s8 + $0x50] sm:$0xff] }
  0x23   : > { %v982_v25 = vld [vmem:[%s1309_s9 + $0x21] sm:$0xff]  ;;  %1074 = vmatpush3.bf16.msra.mxu0 %v1073_v22  ;;  %1084 = vmatpush3.bf16.msra.mxu1 %v1073_v22  ;;  %v983_v34 = vld [vmem:[%s1309_s9 + $0x31] sm:$0xff] }
  0x24   : > { %392 = vrot.lane.b32.xlu1 %v975_v3, %s1217_s30  ;;  %345 = vrot.lane.b32.xlu0 %v981_v0, %s1215_s11  ;;  %v467_v30 = vld [vmem:[%s1359_s8 + $0x40] sm:$0xff]  ;;  %v1000_v37 = vld [vmem:[%s1359_s8 + $0x51] sm:$0xff] }
  0x25   : > { %1075 = vmatprep.subr.bf16.mxu0 %v1216_v9  ;;  %1081 = vmatprep.subr.bf16.mxu1 %v1216_v9  ;;  %v510_v31 = vld [vmem:[%s1359_s8 + $0x41] sm:$0xff]  ;;  %v980_v38 = vld [vmem:[%s1309_s9 + $0x70] sm:$0xff] }
  0x26   : > { %v990_v32 = vld [vmem:[%s1359_s8 + $0x20] sm:$0xff]  ;;  %v991_v39 = vld [vmem:[%s1359_s8 + $0x30] sm:$0xff] }
  0x27   : > { %1077 = vmatpush3.bf16.msra.mxu0 %v1076_v27  ;;  %1085 = vmatpush3.bf16.msra.mxu1 %v1076_v27  ;;  %v986_v35 = vld [vmem:[%s1309_s9 + $0x61] sm:$0xff]  ;;  %v987_v41 = vld [vmem:[%s1309_s9 + $0x71] sm:$0xff]  ;;  %s1090_s9 = smul.u32 42, %s1573_s15 }
  0x28   : > { %477 = vrot.lane.b32.xlu1 %v463_v16, %s1218_s28  ;;  %520 = vrot.lane.b32.xlu0 %v506_v17, %s1219_s12  ;;  %v997_v36 = vld [vmem:[%s1359_s8 + $0x21] sm:$0xff]  ;;  %v998_v42 = vld [vmem:[%s1359_s8 + $0x31] sm:$0xff] }
  0x29   : > { %v994_v40 = vld [vmem:[%s1359_s8 + $0x60] sm:$0xff]  ;;  %v995_v44 = vld [vmem:[%s1359_s8 + $0x70] sm:$0xff] }
  0x2a   : > { %v1001_v43 = vld [vmem:[%s1359_s8 + $0x61] sm:$0xff]  ;;  %v1002_v45 = vld [vmem:[%s1359_s8 + $0x71] sm:$0xff] }
  0x2c   : > { %398 = vrot.lane.b32.xlu0 %v978_v5, %s1217_s30  ;;  %564 = vrot.lane.b32.xlu1 %v989_v19, %s1220_s13 }
  0x30   : > { %435 = vrot.lane.b32.xlu0 %v982_v25, %s1214_s10  ;;  %441 = vrot.lane.b32.xlu1 %v985_v26, %s1214_s10 }
  0x34   : > { %607 = vrot.lane.b32.xlu0 %v996_v29, %s1223_s14  ;;  %479 = vrot.lane.b32.xlu1 %v989_v19, %s1218_s28 }
  0x38   : > { %485 = vrot.lane.b32.xlu0 %v467_v30, %s1218_s28  ;;  %347 = vrot.lane.b32.xlu1 %v982_v25, %s1215_s11 }
  0x3c   : > { %353 = vrot.lane.b32.xlu0 %v985_v26, %s1215_s11  ;;  %522 = vrot.lane.b32.xlu1 %v996_v29, %s1219_s12 }
  0x40   : > { %528 = vrot.lane.b32.xlu0 %v510_v31, %s1219_s12  ;;  %394 = vrot.lane.b32.xlu1 %v1325_v6, %s1217_s30 }
  0x44   : > { %400 = vrot.lane.b32.xlu0 %v1328_v7, %s1217_s30  ;;  %566 = vrot.lane.b32.xlu1 %v990_v32, %s1220_s13 }
  0x48   : > { %572 = vrot.lane.b32.xlu0 %v993_v33, %s1220_s13  ;;  %437 = vrot.lane.b32.xlu1 %v983_v34, %s1214_s10 }
  0x4c   : > { %443 = vrot.lane.b32.xlu0 %v986_v35, %s1214_s10  ;;  %609 = vrot.lane.b32.xlu1 %v997_v36, %s1223_s14 }
  0x50   : > { %615 = vrot.lane.b32.xlu0 %v1000_v37, %s1223_s14  ;;  %481 = vrot.lane.b32.xlu1 %v990_v32, %s1218_s28 }
  0x54   : > { %487 = vrot.lane.b32.xlu0 %v993_v33, %s1218_s28  ;;  %349 = vrot.lane.b32.xlu1 %v983_v34, %s1215_s11 }
  0x58   : > { %355 = vrot.lane.b32.xlu0 %v986_v35, %s1215_s11  ;;  %524 = vrot.lane.b32.xlu1 %v997_v36, %s1219_s12  ;;  %s1091_s11 = smul.u32 84, %s1569_s17 }
  0x5c   : > { %530 = vrot.lane.b32.xlu0 %v1000_v37, %s1219_s12  ;;  %396 = vrot.lane.b32.xlu1 %v1339_v8, %s1217_s30 }
  0x60   : > { %402 = vrot.lane.b32.xlu0 %v980_v38, %s1217_s30  ;;  %568 = vrot.lane.b32.xlu1 %v991_v39, %s1220_s13 }
  0x64   : > { %574 = vrot.lane.b32.xlu0 %v994_v40, %s1220_s13  ;;  %439 = vrot.lane.b32.xlu1 %v1319_v4, %s1214_s10 }
  0x68   : > { %445 = vrot.lane.b32.xlu0 %v987_v41, %s1214_s10  ;;  %611 = vrot.lane.b32.xlu1 %v998_v42, %s1223_s14  ;;  %s1089_s10 = smul.u32 7, %s1575_s16 }
  0x6a   : > { %s304_s25 = sadd.s32 %s1090_s9, %s1089_s10 }
  0x6b   : > { %s306_s27 = sadd.s32 %s1091_s11, %s304_s25 }
  0x6c   : > { %617 = vrot.lane.b32.xlu0 %v1001_v43, %s1223_s14  ;;  %483 = vrot.lane.b32.xlu1 %v991_v39, %s1218_s28  ;;  %s971_s29 = sshll.u32 %s306_s27, 3 }
  0x6d   : > { %s308_s7 = scalar_lea.vmem %s1551_s4, %s971_s29 }
  0x70   : > { %489 = vrot.lane.b32.xlu0 %v994_v40, %s1218_s28  ;;  %526 = vrot.lane.b32.xlu1 %v998_v42, %s1219_s12 }
  0x74   : > { %532 = vrot.lane.b32.xlu0 %v1001_v43, %s1219_s12  ;;  %570 = vrot.lane.b32.xlu1 %v467_v30, %s1220_s13 }
  0x78   : > { %576 = vrot.lane.b32.xlu0 %v995_v44, %s1220_s13  ;;  %613 = vrot.lane.b32.xlu1 %v510_v31, %s1223_s14 }
  0x7c   : > { %619 = vrot.lane.b32.xlu0 %v1002_v45, %s1223_s14 }
  0x8e   : > { %v434_v46 = vpop.permute.xlu1 %433  ;;  %v344_v47 = vpop.permute.xlu0 %343 }
  0x8f   : > { %365 = vst.msk [vmem:[#allocation2] sm:$0xff] %vm364_vm2, %v344_v47 }
  0x92   : > { %v352_v48 = vpop.permute.xlu1 %351  ;;  %v391_v49 = vpop.permute.xlu0 %390 }
  0x93   : > { %369 = vst.msk [vmem:[#allocation2 + $0x20] sm:$0xff] %vm364_vm2, %v352_v48 }
  0x94   : > { %412 = vst.msk [vmem:[#allocation2] sm:$0xff] %vm411_vm3, %v391_v49 }
  0x95   : > { %455 = vst.msk [vmem:[#allocation2] sm:$0xff] %vm454_vm4, %v434_v46 }
  0x96   : > { %v393_v50 = vpop.permute.xlu1 %392  ;;  %v346_v51 = vpop.permute.xlu0 %345 }
  0x97   : > { %366 = vst.msk [vmem:[#allocation2 + $0x8] sm:$0xff] %vm364_vm2, %v346_v51 }
  0x98   : > { %413 = vst.msk [vmem:[#allocation2 + $0x8] sm:$0xff] %vm411_vm3, %v393_v50 }
  0x9a   : > { %v478_v52 = vpop.permute.xlu1 %477  ;;  %v521_v53 = vpop.permute.xlu0 %520 }
  0x9b   : > { %499 = vst.msk [vmem:[#allocation2] sm:$0xff] %vm498_vm5, %v478_v52 }
  0x9c   : > { %542 = vst.msk [vmem:[#allocation2] sm:$0xff] %vm541_vm6, %v521_v53 }
  0x9e   : > { %v399_v54 = vpop.permute.xlu0 %398  ;;  %v565_v55 = vpop.permute.xlu1 %564 }
  0x9f   : > { %416 = vst.msk [vmem:[#allocation2 + $0x20] sm:$0xff] %vm411_vm3, %v399_v54 }
  0xa0   : > { %586 = vst.msk [vmem:[#allocation2] sm:$0xff] %vm585_vm7, %v565_v55 }
  0xa2   : > { %v436_v56 = vpop.permute.xlu0 %435  ;;  %v442_v57 = vpop.permute.xlu1 %441 }
  0xa3   : > { %456 = vst.msk [vmem:[#allocation2 + $0x8] sm:$0xff] %vm454_vm4, %v436_v56  ;;  %459 = vst.msk [vmem:[#allocation2 + $0x20] sm:$0xff] %vm454_vm4, %v442_v57 }
  0xa6   : > { %v608_v58 = vpop.permute.xlu0 %607  ;;  %v480_v59 = vpop.permute.xlu1 %479 }
  0xa7   : > { %629 = vst.msk [vmem:[#allocation2] sm:$0xff] %vm628_vm8, %v608_v58 }
  0xa8   : > { %500 = vst.msk [vmem:[#allocation2 + $0x8] sm:$0xff] %vm498_vm5, %v480_v59 }
  0xaa   : > { %v486_v60 = vpop.permute.xlu0 %485  ;;  %v348_v61 = vpop.permute.xlu1 %347 }
  0xab   : > { %503 = vst.msk [vmem:[#allocation2 + $0x20] sm:$0xff] %vm498_vm5, %v486_v60 }
  0xac   : > { %367 = vst.msk [vmem:[#allocation2 + $0x10] sm:$0xff] %vm364_vm2, %v348_v61 }
  0xae   : > { %v354_v62 = vpop.permute.xlu0 %353  ;;  %v636_v63 = vld [vmem:[#allocation2] sm:$0xff]  ;;  %v523_v0 = vpop.permute.xlu1 %522 }
  0xaf   : > { %370 = vst.msk [vmem:[#allocation2 + $0x28] sm:$0xff] %vm364_vm2, %v354_v62  ;;  %1046 = vmatmul.mubr.msk.f32.vlgmr.msra.gmra.mrb[0].mxu0 %vm660_vm9, %v636_v63 }
  0xb0   : > { %543 = vst.msk [vmem:[#allocation2 + $0x8] sm:$0xff] %vm541_vm6, %v523_v0  ;;  %1048 = vmatprep.mubr.msk.f32.mxu0 %vm1221_vm1, %v1222_v28 }
  0xb2   : > { %v529_v1 = vpop.permute.xlu0 %528  ;;  %v395_v2 = vpop.permute.xlu1 %394 }
  0xb3   : > { %546 = vst.msk [vmem:[#allocation2 + $0x20] sm:$0xff] %vm541_vm6, %v529_v1 }
  0xb4   : > { %414 = vst.msk [vmem:[#allocation2 + $0x10] sm:$0xff] %vm411_vm3, %v395_v2 }
  0xb6   : > { %v401_v3 = vpop.permute.xlu0 %400  ;;  %v567_v4 = vpop.permute.xlu1 %566 }
  0xb7   : > { %417 = vst.msk [vmem:[#allocation2 + $0x28] sm:$0xff] %vm411_vm3, %v401_v3 }
  0xb8   : > { %587 = vst.msk [vmem:[#allocation2 + $0x8] sm:$0xff] %vm585_vm7, %v567_v4 }
  0xba   : > { %v573_v5 = vpop.permute.xlu0 %572  ;;  %v438_v6 = vpop.permute.xlu1 %437 }
  0xbb   : > { %590 = vst.msk [vmem:[#allocation2 + $0x20] sm:$0xff] %vm585_vm7, %v573_v5 }
  0xbc   : > { %457 = vst.msk [vmem:[#allocation2 + $0x10] sm:$0xff] %vm454_vm4, %v438_v6 }
  0xbe   : > { %v444_v7 = vpop.permute.xlu0 %443  ;;  %v610_v8 = vpop.permute.xlu1 %609 }
  0xbf   : > { %460 = vst.msk [vmem:[#allocation2 + $0x28] sm:$0xff] %vm454_vm4, %v444_v7 }
  0xc0   : > { %630 = vst.msk [vmem:[#allocation2 + $0x8] sm:$0xff] %vm628_vm8, %v610_v8 }
  0xc2   : > { %v616_v9 = vpop.permute.xlu0 %615  ;;  %v482_v10 = vpop.permute.xlu1 %481 }
  0xc3   : > { %633 = vst.msk [vmem:[#allocation2 + $0x20] sm:$0xff] %vm628_vm8, %v616_v9 }
  0xc4   : > { %501 = vst.msk [vmem:[#allocation2 + $0x10] sm:$0xff] %vm498_vm5, %v482_v10 }
  0xc6   : > { %v488_v11 = vpop.permute.xlu0 %487  ;;  %v350_v12 = vpop.permute.xlu1 %349 }
  0xc7   : > { %v637_v13 = vld [vmem:[#allocation2 + $0x8] sm:$0xff]  ;;  %504 = vst.msk [vmem:[#allocation2 + $0x28] sm:$0xff] %vm498_vm5, %v488_v11 }
  0xc8   : > { %368 = vst.msk [vmem:[#allocation2 + $0x18] sm:$0xff] %vm364_vm2, %v350_v12  ;;  %1049 = vmatmul.mubr.msk.f32.gmra.mrb[2].mxu0 %vm660_vm9, %v637_v13 }
  0xc9   : > { %1051 = vmatprep.mubr.msk.f32.mxu0 %vm1221_vm1, %v1222_v28 }
  0xca   : > { %v356_v14 = vpop.permute.xlu0 %355  ;;  %v640_v15 = vld [vmem:[#allocation2 + $0x20] sm:$0xff]  ;;  %v525_v16 = vpop.permute.xlu1 %524 }
  0xcb   : > { %371 = vst.msk [vmem:[#allocation2 + $0x30] sm:$0xff] %vm364_vm2, %v356_v14  ;;  %1058 = vmatmul.mubr.msk.f32.vlgmr.msra.gmra.mrb[0].mxu1 %vm660_vm9, %v640_v15 }
  0xcc   : > { %544 = vst.msk [vmem:[#allocation2 + $0x10] sm:$0xff] %vm541_vm6, %v525_v16  ;;  %1060 = vmatprep.mubr.msk.f32.mxu1 %vm1221_vm1, %v1222_v28 }
  0xce   : > { %v531_v17 = vpop.permute.xlu0 %530  ;;  %v397_v18 = vpop.permute.xlu1 %396 }
  0xcf   : > { %547 = vst.msk [vmem:[#allocation2 + $0x28] sm:$0xff] %vm541_vm6, %v531_v17 }
  0xd0   : > { %415 = vst.msk [vmem:[#allocation2 + $0x18] sm:$0xff] %vm411_vm3, %v397_v18 }
  0xd2   : > { %v403_v19 = vpop.permute.xlu0 %402  ;;  %v569_v20 = vpop.permute.xlu1 %568 }
  0xd3   : > { %418 = vst.msk [vmem:[#allocation2 + $0x30] sm:$0xff] %vm411_vm3, %v403_v19 }
  0xd4   : > { %588 = vst.msk [vmem:[#allocation2 + $0x10] sm:$0xff] %vm585_vm7, %v569_v20 }
  0xd6   : > { %v575_v21 = vpop.permute.xlu0 %574  ;;  %v440_v22 = vpop.permute.xlu1 %439 }
  0xd7   : > { %591 = vst.msk [vmem:[#allocation2 + $0x28] sm:$0xff] %vm585_vm7, %v575_v21 }
  0xd8   : > { %458 = vst.msk [vmem:[#allocation2 + $0x18] sm:$0xff] %vm454_vm4, %v440_v22 }
  0xda   : > { %v446_v23 = vpop.permute.xlu0 %445  ;;  %v612_v24 = vpop.permute.xlu1 %611 }
  0xdb   : > { %461 = vst.msk [vmem:[#allocation2 + $0x30] sm:$0xff] %vm454_vm4, %v446_v23 }
  0xdc   : > { %631 = vst.msk [vmem:[#allocation2 + $0x10] sm:$0xff] %vm628_vm8, %v612_v24 }
  0xde   : > { %v618_v25 = vpop.permute.xlu0 %617  ;;  %v484_v26 = vpop.permute.xlu1 %483 }
  0xdf   : > { %634 = vst.msk [vmem:[#allocation2 + $0x28] sm:$0xff] %vm628_vm8, %v618_v25 }
  0xe0   : > { %502 = vst.msk [vmem:[#allocation2 + $0x18] sm:$0xff] %vm498_vm5, %v484_v26 }
  0xe2   : > { %v490_v27 = vpop.permute.xlu0 %489  ;;  %v527_v29 = vpop.permute.xlu1 %526 }
  0xe3   : > { %v638_v30 = vld [vmem:[#allocation2 + $0x10] sm:$0xff]  ;;  %505 = vst.msk [vmem:[#allocation2 + $0x30] sm:$0xff] %vm498_vm5, %v490_v27 }
  0xe4   : > { %545 = vst.msk [vmem:[#allocation2 + $0x18] sm:$0xff] %vm541_vm6, %v527_v29  ;;  %1052 = vmatmul.mubr.msk.f32.gmra.mrb[4].mxu0 %vm660_vm9, %v638_v30 }
  0xe5   : > { %1054 = vmatprep.mubr.msk.f32.mxu0 %vm1221_vm1, %v1222_v28 }
  0xe6   : > { %v533_v31 = vpop.permute.xlu0 %532  ;;  %v641_v32 = vld [vmem:[#allocation2 + $0x28] sm:$0xff]  ;;  %v571_v33 = vpop.permute.xlu1 %570 }
  0xe7   : > { %548 = vst.msk [vmem:[#allocation2 + $0x30] sm:$0xff] %vm541_vm6, %v533_v31  ;;  %1061 = vmatmul.mubr.msk.f32.gmra.mrb[2].mxu1 %vm660_vm9, %v641_v32 }
  0xe8   : > { %589 = vst.msk [vmem:[#allocation2 + $0x18] sm:$0xff] %vm585_vm7, %v571_v33  ;;  %1063 = vmatprep.mubr.msk.f32.mxu1 %vm1221_vm1, %v1222_v28  ;;  %v1004_v28 = vld [vmem:[%s1550_s3] ss:$0 sm:$0xff] }
  0xea   : > { %v577_v34 = vpop.permute.xlu0 %576  ;;  %v614_v35 = vpop.permute.xlu1 %613 }
  0xeb   : > { %592 = vst.msk [vmem:[#allocation2 + $0x30] sm:$0xff] %vm585_vm7, %v577_v34 }
  0xec   : > { %632 = vst.msk [vmem:[#allocation2 + $0x18] sm:$0xff] %vm628_vm8, %v614_v35 }
  0xee   : > { %v620_v36 = vpop.permute.xlu0 %619 }
  0xef   : > { %635 = vst.msk [vmem:[#allocation2 + $0x30] sm:$0xff] %vm628_vm8, %v620_v36 }
  0xf3   : > { %v639_v37 = vld [vmem:[#allocation2 + $0x18] sm:$0xff] }
  0xf4   : > { %1055 = vmatmul.mubr.msk.f32.gmra.mrb[6].mxu0 %vm660_vm9, %v639_v37 }
  0xf6   : > { %v642_v38 = vld [vmem:[#allocation2 + $0x30] sm:$0xff] }
  0xf7   : > { %1064 = vmatmul.mubr.msk.f32.gmra.mrb[4].mxu1 %vm660_vm9, %v642_v38 }
 0x182   : > { %v748_v39 = vpop.f32.mrb[0].mxu0 }
 0x183   : > { %v749_v40 = vadd.f32 %v1004_v28, %v748_v39  ;;  %v1047_v41 = vpop.f32.mrb[1].mxu0 }
 0x185   : > { %782 = vst.msk [vmem:[%s308_s7] sm:$0xff] %vm321_vm0, %v749_v40 }
 0x19b   : > { %v753_v42 = vpop.f32.mrb[2].mxu0 }
 0x19c   : > { %v754_v43 = vadd.f32 %v1004_v28, %v753_v42  ;;  %v1050_v44 = vpop.f32.mrb[3].mxu0 }
 0x19e   : > { %783 = vst.msk [vmem:[%s308_s7 + $0x8] sm:$0xff] %vm321_vm0, %v754_v43  ;;  %v768_v45 = vpop.f32.mrb[0].mxu1 }
 0x19f   : > { %v769_v46 = vadd.f32 %v1004_v28, %v768_v45  ;;  %v1059_v47 = vpop.f32.mrb[1].mxu1 }
 0x1a1   : > { %786 = vst.msk [vmem:[%s308_s7 + $0x20] sm:$0xff] %vm321_vm0, %v769_v46 }
 0x1b7   : > { %v758_v48 = vpop.f32.mrb[4].mxu0 }
 0x1b8   : > { %v759_v49 = vadd.f32 %v1004_v28, %v758_v48  ;;  %v1053_v50 = vpop.f32.mrb[5].mxu0 }
 0x1ba   : > { %784 = vst.msk [vmem:[%s308_s7 + $0x10] sm:$0xff] %vm321_vm0, %v759_v49  ;;  %v773_v51 = vpop.f32.mrb[2].mxu1 }
 0x1bb   : > { %v774_v52 = vadd.f32 %v1004_v28, %v773_v51  ;;  %v1062_v53 = vpop.f32.mrb[3].mxu1 }
 0x1bd   : > { %787 = vst.msk [vmem:[%s308_s7 + $0x28] sm:$0xff] %vm321_vm0, %v774_v52 }
 0x1c7   : > { %v763_v54 = vpop.f32.mrb[6].mxu0 }
 0x1c8   : > { %v764_v55 = vadd.f32 %v1004_v28, %v763_v54  ;;  %v1056_v56 = vpop.f32.mrb[7].mxu0 }
 0x1ca   : > { %785 = vst.msk [vmem:[%s308_s7 + $0x18] sm:$0xff] %vm321_vm0, %v764_v55  ;;  %v778_v57 = vpop.f32.mrb[4].mxu1 }
 0x1cb   : > { %v779_v58 = vadd.f32 %v1004_v28, %v778_v57  ;;  %v1065_v59 = vpop.f32.mrb[5].mxu1 }
 0x1cd   : > { %788 = vst.msk [vmem:[%s308_s7 + $0x30] sm:$0xff] %vm321_vm0, %v779_v58 }
 0x1ce PF: > { %s14_s21 = sadd.s32 1, %s1212_s21   ;;  %s1552_s15 = smov %s1200_s18 }
 0x1cf   : > { %p11_p11 = scmp.ge.s32.totalorder %s14_s21, 26   ;;  %s1553_s16 = smov %s1204_s19 }
 0x1d0   : > { %s1554_s17 = smov %s1208_s20  ;;  %s1555_s18 = smov %s1559_s22 }
 0x1d1   : > { %s1556_s19 = smov %s1563_s23  ;;  %s1557_s20 = smov %s1567_s24 }
 0x1d2   :  { %13 = sbr.rel (!%p11_p11) target bundleno = 4 (0x4), region = 74 }

// kernel: conv_transpose3d_pallas.4
= control target key start
LH: loop header
LB: loop body
LE: loop exit
PB: predicated region body
PF: predicated region fallthrough
CT: control target
= control target key end

     0   :  { %s811_s12 = smov 0   ;;  %s813_s13 = smov 0   ;;  %s943_s0 = inlined_call_operand.vmem [shape: f32[2,7,9,9,8], index: 0, kind: input, shape index: {}]   ;;  %s944_s1 = inlined_call_operand.vmem [shape: f32[2,16,8], index: 1, kind: input, shape index: {}]   ;;  %s945_s2 = inlined_call_operand.vmem [shape: f32[1,8], index: 2, kind: input, shape index: {}]   ;;  %s946_s3 = inlined_call_operand.vmem [shape: f32[2,2,6,7,8,8], index: 3, kind: output, shape index: {}]  }
   0x1   :  { %s815_s14 = smov 0   ;;  %s817_s15 = smov 0  }
   0x2   :  { %s819_s16 = smov 0   ;;  %s821_s17 = smov 0  }
   0x3   :  { %s823_s18 = smov 0  }
   0x4 LB: > { %s28_s19 = sadd.s32 1, %s773_s15  ;;  %s35_s20 = sadd.s32 1, %s777_s16  ;;  %s785_s18 = sphi %s823_s18, %s13_s18   ;;  %s781_s17 = sphi %s821_s17, %s952_s17   ;;  %s777_s16 = sphi %s819_s16, %s951_s16   ;;  %s773_s15 = sphi %s817_s15, %s950_s15   ;;  %s769_s14 = sphi %s815_s14, %s949_s14   ;;  %s765_s13 = sphi %s813_s13, %s948_s13   ;;  %s761_s12 = sphi %s811_s12, %s947_s12  }
   0x5   : > { %p29_p0 = scmp.ge.s32.totalorder %s28_s19, 2  ;;  %p604_p1 = scmp.ge.s32.totalorder %s785_s18, 1 }
   0x6   : > { %p175_p2 = scmp.lt.s32.totalorder %s785_s18, 25  ;;  %s39_s21 = sadd.s32 1, %s781_s17 }
   0x7   : > { %s954_s19 = smov (%p29_p0, %s28_s19), 0  ;;  %s956_s20 = smov (!%p29_p0, %s35_s20), %s777_s16 }
   0x8   : > { %p176_p3 = pnand %p604_p1, %p175_p2  ;;  %p37_p4 = scmp.ge.s32.totalorder %s956_s20, 6 }
   0x9   : > { %p215_p6 = scmp.lt.s32.totalorder (!%p176_p3), %s769_s14, 1  ;;  %p217_p7 = scmp.lt.s32.totalorder (!%p176_p3), %s765_s13, 6  ;;  %v787_v0 = vmov (!%p176_p3), 0.0|0.0   ;;  %vm788_vm0 = vmmov (!%p176_p3), 0   ;;  %v789_v1 = vmov (!%p176_p3), 0.0   ;;  %vm253_vm1 = vcmask (!%p176_p3), 64512  }
   0xa   : > { %s958_s20 = smov (%p37_p4, %s956_s20), 0  ;;  %s960_s21 = smov (!%p37_p4, %s39_s21), %s781_s17 }
   0xb   : > { %p41_p5 = scmp.ge.s32.totalorder %s960_s21, 2  ;;  %179 = sbr.rel (%p176_p3) target bundleno = 378 (0x17a), region = 32  ;;  %661 = vmatprep.subr.bf16.mxu0 (!%p176_p3), %v787_v0  ;;  %664 = vmatprep.subr.bf16.mxu1 (!%p176_p3), %v787_v0  ;;  %vm300_vm2 = vcmask (!%p176_p3), 130112   ;;  %vm326_vm3 = vcmask (!%p176_p3), 130048   ;;  %v617_v27 = vld [vmem:[%s945_s2] ss:$0 sm:$0xff] (!%p176_p3) }
   0xc   : > { %s607_s22 = sshll.u32 (!%p176_p3), %s761_s12, 4  ;;  %640 = vmatprep.mubr.msk.f32.mxu0 (!%p176_p3), %vm788_vm0, %v789_v1  ;;  %652 = vmatprep.mubr.msk.f32.mxu1 (!%p176_p3), %vm788_vm0, %v789_v1  ;;  %s790_s8 = smov (!%p176_p3), 8  }
   0xd   : > { %s962_s21 = smov (%p41_p5, %s960_s21), 0  ;;  %s316_s27 = scalar_lea.vmem (!%p176_p3), %s944_s1, %s607_s22 }
   0xe   : > { %v317_v2 = vld [vmem:[%s316_s27] sm:$0xff] (!%p176_p3)  ;;  %v318_v3 = vld [vmem:[%s316_s27 + $0x8] sm:$0xff] (!%p176_p3)  ;;  %p227_p8 = scmp.lt.s32.totalorder (!%p176_p3), %s761_s12, 1  ;;  %p229_p9 = scmp.lt.s32.totalorder (!%p176_p3), %s765_s13, 5 }
   0xf   : > { %v662_v4 = vpack.c.bf16 (!%p176_p3), %v318_v3, %v317_v2 }
  0x11   : > { %663 = vmatpush3.bf16.msra.mxu0 (!%p176_p3), %v662_v4  ;;  %665 = vmatpush3.bf16.msra.mxu1 (!%p176_p3), %v662_v4 }
  0x12   : > { %s964_s14 = smov (!%p215_p6, %s769_s14), 1  ;;  %s966_s12 = smov (!%p227_p8, %s761_s12), 1 }
  0x13   : > { %s218_s23 = scalar_select %p217_p7, %s765_s13, 6 }
  0x14   : > { %s667_s24 = smul.u32 126, %s964_s14  ;;  %s968_s13 = smov (!%p229_p9, %s765_s13), 5 }
  0x15   : > { %s666_s28 = smul.u32 18, %s218_s23 }
  0x16   : > { %s669_s9 = smul.u32 42, %s966_s12 }
  0x17   : > { %s221_s29 = sadd.s32 %s667_s24, %s666_s28  ;;  %s668_s10 = smul.u32 7, %s968_s13 }
  0x18   : > { %s605_s30 = sshll.u32 %s221_s29, 3  ;;  %s670_s11 = smul.u32 84, %s964_s14 }
  0x19   : > { %s223_s6 = scalar_lea.vmem %s943_s0, %s605_s30 }
  0x1a   : > { %s245_s7 = scalar_lea.vmem %s223_s6, %s607_s22  ;;  %s236_s22 = sadd.s32 %s669_s9, %s668_s10 }
  0x1b   : > { %v609_v5 = vld [vmem:[%s245_s7 + $0x10] sm:$0xff]  ;;  %v610_v7 = vld [vmem:[%s245_s7 + $0x20] sm:$0xff]  ;;  %s238_s23 = sadd.s32 %s670_s11, %s236_s22 }
  0x1c   : > { %v613_v6 = vld [vmem:[%s245_s7 + $0x50] sm:$0xff]  ;;  %279 = vrot.lane.b32.xlu0 %v609_v5, %s790_s8  ;;  %v614_v9 = vld [vmem:[%s245_s7 + $0x60] sm:$0xff]  ;;  %255 = vst.msk [vmem:[#allocation2 + $0x8] sm:$0xff] %vm253_vm1, %v609_v5  ;;  %256 = vst.msk [vmem:[#allocation2 + $0x10] sm:$0xff] %vm253_vm1, %v610_v7  ;;  %s606_s24 = sshll.u32 %s238_s23, 3 }
  0x1d   : > { %287 = vrot.lane.b32.xlu1 %v613_v6, %s790_s8  ;;  %v611_v8 = vld [vmem:[%s245_s7 + $0x30] sm:$0xff]  ;;  %259 = vst.msk [vmem:[#allocation2 + $0x28] sm:$0xff] %vm253_vm1, %v613_v6  ;;  %v612_v10 = vld [vmem:[%s245_s7 + $0x40] sm:$0xff]  ;;  %260 = vst.msk [vmem:[#allocation2 + $0x30] sm:$0xff] %vm253_vm1, %v614_v9  ;;  %s240_s29 = scalar_lea.vmem %s946_s3, %s606_s24 }
  0x1e   : > { %v246_v11 = vld [vmem:[%s245_s7] sm:$0xff]  ;;  %257 = vst.msk [vmem:[#allocation2 + $0x18] sm:$0xff] %vm253_vm1, %v611_v8  ;;  %258 = vst.msk [vmem:[#allocation2 + $0x20] sm:$0xff] %vm253_vm1, %v612_v10  ;;  %v615_v12 = vld [vmem:[%s245_s7 + $0x70] sm:$0xff] }
  0x1f   : > { %254 = vst.msk [vmem:[#allocation2] sm:$0xff] %vm253_vm1, %v246_v11 }
  0x20   : > { %281 = vrot.lane.b32.xlu0 %v610_v7, %s790_s8 }
  0x21   : > { %283 = vrot.lane.b32.xlu1 %v611_v8, %s790_s8 }
  0x24   : > { %289 = vrot.lane.b32.xlu0 %v614_v9, %s790_s8 }
  0x25   : > { %285 = vrot.lane.b32.xlu1 %v612_v10, %s790_s8 }
  0x28   : > { %291 = vrot.lane.b32.xlu0 %v615_v12, %s790_s8 }
  0x8e   : > { %v280_v13 = vpop.permute.xlu0 %279 }
  0x8f   : > { %v288_v14 = vpop.permute.xlu1 %287  ;;  %301 = vst.msk [vmem:[#allocation2] sm:$0xff] %vm300_vm2, %v280_v13 }
  0x90   : > { %305 = vst.msk [vmem:[#allocation2 + $0x20] sm:$0xff] %vm300_vm2, %v288_v14 }
  0x92   : > { %v282_v15 = vpop.permute.xlu0 %281 }
  0x93   : > { %v284_v16 = vpop.permute.xlu1 %283  ;;  %302 = vst.msk [vmem:[#allocation2 + $0x8] sm:$0xff] %vm300_vm2, %v282_v15 }
  0x94   : > { %303 = vst.msk [vmem:[#allocation2 + $0x10] sm:$0xff] %vm300_vm2, %v284_v16 }
  0x96   : > { %v290_v17 = vpop.permute.xlu0 %289  ;;  %v308_v18 = vld [vmem:[#allocation2] sm:$0xff] }
  0x97   : > { %v286_v19 = vpop.permute.xlu1 %285  ;;  %v312_v20 = vld [vmem:[#allocation2 + $0x20] sm:$0xff]  ;;  %306 = vst.msk [vmem:[#allocation2 + $0x28] sm:$0xff] %vm300_vm2, %v290_v17  ;;  %641 = vmatmul.mubr.msk.f32.vlgmr.msra.gmra.mrb[0].mxu0 %vm326_vm3, %v308_v18 }
  0x98   : > { %304 = vst.msk [vmem:[#allocation2 + $0x18] sm:$0xff] %vm300_vm2, %v286_v19  ;;  %653 = vmatmul.mubr.msk.f32.vlgmr.msra.gmra.mrb[0].mxu1 %vm326_vm3, %v312_v20  ;;  %643 = vmatprep.mubr.msk.f32.mxu0 %vm788_vm0, %v789_v1 }
  0x99   : > { %655 = vmatprep.mubr.msk.f32.mxu1 %vm788_vm0, %v789_v1 }
  0x9a   : > { %v292_v21 = vpop.permute.xlu0 %291  ;;  %v309_v22 = vld [vmem:[#allocation2 + $0x8] sm:$0xff] }
  0x9b   : > { %307 = vst.msk [vmem:[#allocation2 + $0x30] sm:$0xff] %vm300_vm2, %v292_v21  ;;  %644 = vmatmul.mubr.msk.f32.gmra.mrb[2].mxu0 %vm326_vm3, %v309_v22  ;;  %v310_v23 = vld [vmem:[#allocation2 + $0x10] sm:$0xff] }
  0x9c   : > { %646 = vmatprep.mubr.msk.f32.mxu0 %vm788_vm0, %v789_v1 }
  0x9e   : > { %v313_v24 = vld [vmem:[#allocation2 + $0x28] sm:$0xff] }
  0x9f   : > { %647 = vmatmul.mubr.msk.f32.gmra.mrb[4].mxu0 %vm326_vm3, %v310_v23  ;;  %656 = vmatmul.mubr.msk.f32.gmra.mrb[2].mxu1 %vm326_vm3, %v313_v24  ;;  %v311_v25 = vld [vmem:[#allocation2 + $0x18] sm:$0xff] }
  0xa0   : > { %649 = vmatprep.mubr.msk.f32.mxu0 %vm788_vm0, %v789_v1  ;;  %658 = vmatprep.mubr.msk.f32.mxu1 %vm788_vm0, %v789_v1 }
  0xa2   : > { %v314_v26 = vld [vmem:[#allocation2 + $0x30] sm:$0xff] }
  0xa3   : > { %650 = vmatmul.mubr.msk.f32.gmra.mrb[6].mxu0 %vm326_vm3, %v311_v25  ;;  %659 = vmatmul.mubr.msk.f32.gmra.mrb[4].mxu1 %vm326_vm3, %v314_v26 }
 0x16a   : > { %v414_v28 = vpop.f32.mrb[0].mxu0 }
 0x16b   : > { %v434_v29 = vpop.f32.mrb[0].mxu1  ;;  %v415_v30 = vadd.f32 %v617_v27, %v414_v28  ;;  %v642_v31 = vpop.f32.mrb[1].mxu0 }
 0x16c   : > { %v435_v32 = vadd.f32 %v617_v27, %v434_v29  ;;  %v654_v33 = vpop.f32.mrb[1].mxu1 }
 0x16d   : > { %448 = vst.msk [vmem:[%s240_s29] sm:$0xff] %vm253_vm1, %v415_v30 }
 0x16e   : > { %452 = vst.msk [vmem:[%s240_s29 + $0x20] sm:$0xff] %vm253_vm1, %v435_v32  ;;  %v419_v34 = vpop.f32.mrb[2].mxu0 }
 0x16f   : > { %v420_v35 = vadd.f32 %v617_v27, %v419_v34  ;;  %v645_v36 = vpop.f32.mrb[3].mxu0 }
 0x171   : > { %449 = vst.msk [vmem:[%s240_s29 + $0x8] sm:$0xff] %vm253_vm1, %v420_v35 }
 0x172   : > { %v424_v37 = vpop.f32.mrb[4].mxu0  ;;  %v439_v38 = vpop.f32.mrb[2].mxu1 }
 0x173   : > { %v425_v39 = vadd.f32 %v617_v27, %v424_v37  ;;  %v440_v40 = vadd.f32 %v617_v27, %v439_v38  ;;  %v648_v41 = vpop.f32.mrb[5].mxu0  ;;  %v657_v42 = vpop.f32.mrb[3].mxu1 }
 0x175   : > { %450 = vst.msk [vmem:[%s240_s29 + $0x10] sm:$0xff] %vm253_vm1, %v425_v39  ;;  %453 = vst.msk [vmem:[%s240_s29 + $0x28] sm:$0xff] %vm253_vm1, %v440_v40 }
 0x176   : > { %v429_v43 = vpop.f32.mrb[6].mxu0  ;;  %v444_v44 = vpop.f32.mrb[4].mxu1 }
 0x177   : > { %v430_v45 = vadd.f32 %v617_v27, %v429_v43  ;;  %v445_v46 = vadd.f32 %v617_v27, %v444_v44  ;;  %v651_v47 = vpop.f32.mrb[7].mxu0  ;;  %v660_v48 = vpop.f32.mrb[5].mxu1 }
 0x179   : > { %451 = vst.msk [vmem:[%s240_s29 + $0x18] sm:$0xff] %vm253_vm1, %v430_v45  ;;  %454 = vst.msk [vmem:[%s240_s29 + $0x30] sm:$0xff] %vm253_vm1, %v445_v46 }
 0x17a PF: > { %s13_s18 = sadd.s32 1, %s785_s18   ;;  %s947_s12 = smov %s773_s15 }
 0x17b   : > { %p10_p10 = scmp.ge.s32.totalorder %s13_s18, 26   ;;  %s948_s13 = smov %s777_s16 }
 0x17c   : > { %s949_s14 = smov %s781_s17  ;;  %s950_s15 = smov %s954_s19 }
 0x17d   : > { %s951_s16 = smov %s958_s20  ;;  %s952_s17 = smov %s962_s21 }
 0x17e   :  { %12 = sbr.rel (!%p10_p10) target bundleno = 4 (0x4), region = 65 }

</bundles_post_ra>
